<compile_context>
chip_gen: v6e
topology: v6e:2x2x1
jax: 0.10.0
libtpu: 0.0.40
codegen_flags: <defaults>
</compile_context>

<pallas_src>
import jax
import jax.numpy as jnp
from jax import lax
from jax.experimental import pallas as pl
from jax.experimental.pallas import tpu as pltpu


# ------------------------------ Pallas kernel ------------------------------ #

def _lenet5_kernel(x_ref, w1_ref, b1_ref, ph1_ref, pw1_ref,
                   w2_ref, b2_ref, ph2_ref, pw2_ref,
                   w3_ref, b3_ref, w4_ref, b4_ref, w5_ref, b5_ref,
                   out_ref, p1_ref, p2_ref):
    """Whole LeNet-5 forward for one image (one grid step).

    x_ref : (1, 32, 32)   padded input image
    w1_ref: (5, 32, 168)  conv1 banded weights  [kh, w,        co*28 + ow]
    w2_ref: (5, 84, 160)  conv2 banded weights  [kh, ci*14+w,  co*10 + ow]
    ph*/pw*: constant 2x2 average-pooling matrices
    w3_ref: (5, 80, 120)  fc1 weights split by pooled row index h
    w4_ref: (120, 84), w5_ref: (84, 10)  fc2 / fc3 weights
    b*_ref: broadcast-ready bias row vectors
    p1_ref: (14, 84) VMEM scratch -- pool1 output (ci*14 + w on lanes)
    p2_ref: (5, 80)  VMEM scratch -- pool2 output (co*5  + w on lanes)
    """
    f32 = jnp.float32

    # conv1 (5x5, pad=2 already applied) + bias + tanh:
    # 5 accumulating matmuls over the kh row shifts; the kw taps and the 6
    # output channels are folded into the banded weight's 168 lane-dense cols.
    acc1 = jnp.zeros((28, 168), f32)
    for kh in range(5):
        acc1 = acc1 + jnp.dot(x_ref[0, kh:kh + 28, :], w1_ref[kh],
                              preferred_element_type=f32)
    y1 = jnp.tanh(acc1 + b1_ref[...])                                # (28, 168)

    # pool1: 2x2 average as two constant matmuls (rows, then per-channel cols).
    p1_ref[...] = jnp.dot(
        ph1_ref[...],
        jnp.dot(y1, pw1_ref[...], preferred_element_type=f32),
        preferred_element_type=f32)                                  # (14, 84)

    # conv2 (5x5, valid) + bias + tanh, same banded-matmul scheme.
    acc2 = jnp.zeros((10, 160), f32)
    for kh in range(5):
        acc2 = acc2 + jnp.dot(p1_ref[kh:kh + 10, :], w2_ref[kh],
                              preferred_element_type=f32)
    y2 = jnp.tanh(acc2 + b2_ref[...])                                # (10, 160)

    # pool2.
    p2_ref[...] = jnp.dot(
        ph2_ref[...],
        jnp.dot(y2, pw2_ref[...], preferred_element_type=f32),
        preferred_element_type=f32)                                  # (5, 80)

    # fc1: sum of 5 per-row matmuls reproduces PyTorch's NCHW flatten order
    # (fc1 weight rows were pre-permuted in the wrapper accordingly).
    acc3 = jnp.zeros((1, 120), f32)
    for h in range(5):
        acc3 = acc3 + jnp.dot(p2_ref[h:h + 1, :], w3_ref[h],
                              preferred_element_type=f32)
    z1 = jnp.tanh(acc3 + b3_ref[...])                                # (1, 120)

    z2 = jnp.tanh(jnp.dot(z1, w4_ref[...], preferred_element_type=f32)
                  + b4_ref[...])                                     # (1, 84)

    out_ref[0] = (jnp.dot(z2, w5_ref[...], preferred_element_type=f32)
                  + b5_ref[...])                                     # (1, 10)


# --------------------------- weight preparation ----------------------------- #

def _banded_conv_weight(w, in_w, out_w):
    """OIHW conv weight -> (KH, CI*in_w, CO*out_w) banded matmul weight.

    band[kh, ci*in_w + x, co*out_w + ox] = w[co, ci, kh, x - ox]
    for 0 <= x - ox < KW, else 0, so (kh-shifted input rows) @ band performs
    the kw / input-channel / output-channel part of the convolution.
    """
    CO, CI, KH, KW = w.shape
    x = jnp.arange(in_w)[:, None]
    ox = jnp.arange(out_w)[None, :]
    diff = x - ox
    valid = ((diff >= 0) & (diff < KW)).astype(w.dtype)
    diff_c = jnp.clip(diff, 0, KW - 1)
    wt = jnp.transpose(w, (2, 1, 0, 3))                 # (KH, CI, CO, KW)
    band = wt[..., diff_c] * valid                       # (KH, CI, CO, in_w, out_w)
    band = jnp.transpose(band, (0, 1, 3, 2, 4))          # (KH, CI, in_w, CO, out_w)
    return band.reshape(KH, CI * in_w, CO * out_w)


def _pool_rows(n_out):
    """(n_out, 2*n_out) matrix averaging adjacent row pairs (weights 0.5)."""
    r = jnp.arange(n_out)[:, None]
    c = jnp.arange(2 * n_out)[None, :]
    return jnp.where((c == 2 * r) | (c == 2 * r + 1), 0.5, 0.0).astype(jnp.float32)


def _pool_cols(channels, n_out):
    """(channels*2*n_out, channels*n_out) block-diagonal column pooling matrix."""
    return jnp.kron(jnp.eye(channels, dtype=jnp.float32), _pool_rows(n_out).T)


# ------------------------------ forward pass -------------------------------- #

def lenet5_forward(x, p):
    """x: NCHW f32 (B, 1, 28, 28) -> logits (B, 10), single fused Pallas kernel."""
    B = x.shape[0]

    # ---- cheap XLA-side parameter prep (no activation-sized tensors) ------- #
    xp = jnp.pad(x, ((0, 0), (0, 0), (2, 2), (2, 2)))[:, 0]     # (B, 32, 32)

    w1b = _banded_conv_weight(p["conv1_w"], 32, 28)             # (5, 32, 168)
    b1r = jnp.repeat(p["conv1_b"], 28)[None, :]                 # (1, 168)
    ph1 = _pool_rows(14)                                        # (14, 28)
    pw1 = _pool_cols(6, 14)                                     # (168, 84)

    w2b = _banded_conv_weight(p["conv2_w"], 14, 10)             # (5, 84, 160)
    b2r = jnp.repeat(p["conv2_b"], 10)[None, :]                 # (1, 160)
    ph2 = _pool_rows(5)                                         # (5, 10)
    pw2 = _pool_cols(16, 5)                                     # (160, 80)

    # fc1: permute rows from PyTorch's (c, h, w) flatten order to the kernel's
    # (h, c, w) order so it consumes pool2 rows directly.
    w3 = jnp.transpose(p["fc1_w"].reshape(120, 16, 5, 5), (2, 1, 3, 0))
    w3 = w3.reshape(5, 80, 120)                                 # (h, c*5+w, out)
    b3 = p["fc1_b"][None, :]                                    # (1, 120)
    w4 = p["fc2_w"].T                                           # (120, 84)
    b4 = p["fc2_b"][None, :]
    w5 = p["fc3_w"].T                                           # (84, 10)
    b5 = p["fc3_b"][None, :]

    weights = (w1b, b1r, ph1, pw1, w2b, b2r, ph2, pw2, w3, b3, w4, b4, w5, b5)

    def _resident(a):
        zeros = (0,) * a.ndim
        return pl.BlockSpec(a.shape, lambda b, zeros=zeros: zeros)

    out = pl.pallas_call(
        _lenet5_kernel,
        out_shape=jax.ShapeDtypeStruct((B, 1, 10), jnp.float32),
        grid=(B,),
        in_specs=[pl.BlockSpec((1, 32, 32), lambda b: (b, 0, 0))]
                 + [_resident(a) for a in weights],
        out_specs=pl.BlockSpec((1, 1, 10), lambda b: (b, 0, 0)),
        scratch_shapes=[pltpu.VMEM((14, 84), jnp.float32),
                        pltpu.VMEM((5, 80), jnp.float32)],
        compiler_params=pltpu.CompilerParams(
            dimension_semantics=("parallel",)),
    )(xp, *weights)
    return out.reshape(B, 10)


# --------------------------- pure-JAX reference ----------------------------- #

def _avgpool_ref(y_nchw):
    B, C, H, W = y_nchw.shape
    return y_nchw.reshape(B, C, H // 2, 2, W // 2, 2).mean(axis=(3, 5))


def lenet5_ref(x, p):
    hi = lax.Precision.HIGHEST
    dn1 = lax.conv_dimension_numbers(x.shape, p["conv1_w"].shape,
                                     ("NCHW", "OIHW", "NCHW"))
    y = lax.conv_general_dilated(x, p["conv1_w"], (1, 1), ((2, 2), (2, 2)),
                                 dimension_numbers=dn1, precision=hi)
    y = jnp.tanh(y + p["conv1_b"][None, :, None, None])
    y = _avgpool_ref(y)
    dn2 = lax.conv_dimension_numbers(y.shape, p["conv2_w"].shape,
                                     ("NCHW", "OIHW", "NCHW"))
    y = lax.conv_general_dilated(y, p["conv2_w"], (1, 1), ((0, 0), (0, 0)),
                                 dimension_numbers=dn2, precision=hi)
    y = jnp.tanh(y + p["conv2_b"][None, :, None, None])
    y = _avgpool_ref(y)
    y = y.reshape(y.shape[0], -1)
    y = jnp.tanh(jnp.dot(y, p["fc1_w"].T, precision=hi) + p["fc1_b"])
    y = jnp.tanh(jnp.dot(y, p["fc2_w"].T, precision=hi) + p["fc2_b"])
    return jnp.dot(y, p["fc3_w"].T, precision=hi) + p["fc3_b"]


# ------------------------------ param setup --------------------------------- #

def init_params(seed=42):
    keys = jax.random.split(jax.random.PRNGKey(seed), 10)

    def u(k, shape, fan_in):
        bound = 1.0 / jnp.sqrt(jnp.float32(fan_in))
        return jax.random.uniform(k, shape, jnp.float32, -bound, bound)

    return {
        "conv1_w": u(keys[0], (6, 1, 5, 5), 1 * 5 * 5),
        "conv1_b": u(keys[1], (6,), 1 * 5 * 5),
        "conv2_w": u(keys[2], (16, 6, 5, 5), 6 * 5 * 5),
        "conv2_b": u(keys[3], (16,), 6 * 5 * 5),
        "fc1_w": u(keys[4], (120, 400), 400),
        "fc1_b": u(keys[5], (120,), 400),
        "fc2_w": u(keys[6], (84, 120), 120),
        "fc2_b": u(keys[7], (84,), 120),
        "fc3_w": u(keys[8], (10, 84), 84),
        "fc3_b": u(keys[9], (10,), 84),
    }


# ---------------------------------- main ------------------------------------ #

if __name__ == "__main__":
    params = init_params()
    # LeNet-5 geometry requires 28x28 inputs (fc1 expects 5*5*16 = 400 features).
    x = jax.random.normal(jax.random.PRNGKey(0), (2, 1, 28, 28), jnp.float32)

    out = jax.block_until_ready(jax.jit(lenet5_forward)(x, params))
    assert out.shape == (2, 10) and out.dtype == jnp.float32

    ref = jax.block_until_ready(lenet5_ref(x, params))
    assert jnp.allclose(out, ref, rtol=1e-2, atol=1e-2), (
        f"max abs err {jnp.max(jnp.abs(out - ref))}")

    print("KERNEL_OK")
</pallas_src>

<mosaic_0001>
module attributes {stable_mosaic.version = 11 : i64} {
  func.func @_lenet5_kernel(%arg0: i32, %arg1: memref<1x32x32xf32, #tpu.memory_space<vmem>>, %arg2: memref<5x32x168xf32, #tpu.memory_space<vmem>>, %arg3: memref<1x168xf32, #tpu.memory_space<vmem>>, %arg4: memref<14x28xf32, #tpu.memory_space<vmem>>, %arg5: memref<168x84xf32, #tpu.memory_space<vmem>>, %arg6: memref<5x84x160xf32, #tpu.memory_space<vmem>>, %arg7: memref<1x160xf32, #tpu.memory_space<vmem>>, %arg8: memref<5x10xf32, #tpu.memory_space<vmem>>, %arg9: memref<160x80xf32, #tpu.memory_space<vmem>>, %arg10: memref<5x80x120xf32, #tpu.memory_space<vmem>>, %arg11: memref<1x120xf32, #tpu.memory_space<vmem>>, %arg12: memref<120x84xf32, #tpu.memory_space<vmem>>, %arg13: memref<1x84xf32, #tpu.memory_space<vmem>>, %arg14: memref<84x10xf32, #tpu.memory_space<vmem>>, %arg15: memref<1x10xf32, #tpu.memory_space<vmem>>, %arg16: memref<1x1x10xf32, #tpu.memory_space<vmem>>, %arg17: memref<14x84xf32, #tpu.memory_space<vmem>>, %arg18: memref<5x80xf32, #tpu.memory_space<vmem>>) attributes {dimension_semantics = [#tpu.dimension_semantics<parallel>], iteration_bounds = array<i64: 2>, scalar_prefetch = 0 : i64, scratch_operands = 2 : i64, tpu.core_type = #tpu.core_type<tc>, window_params = [{transform_indices = @transform_0, window_bounds = array<i64: 1, 32, 32>}, {pipeline_mode = #tpu.pipeline_mode<synchronous>, transform_indices = @transform_1, window_bounds = array<i64: 5, 32, 168>}, {pipeline_mode = #tpu.pipeline_mode<synchronous>, transform_indices = @transform_2, window_bounds = array<i64: 1, 168>}, {pipeline_mode = #tpu.pipeline_mode<synchronous>, transform_indices = @transform_3, window_bounds = array<i64: 14, 28>}, {pipeline_mode = #tpu.pipeline_mode<synchronous>, transform_indices = @transform_4, window_bounds = array<i64: 168, 84>}, {pipeline_mode = #tpu.pipeline_mode<synchronous>, transform_indices = @transform_5, window_bounds = array<i64: 5, 84, 160>}, {pipeline_mode = #tpu.pipeline_mode<synchronous>, transform_indices = @transform_6, window_bounds = array<i64: 1, 160>}, {pipeline_mode = #tpu.pipeline_mode<synchronous>, transform_indices = @transform_7, window_bounds = array<i64: 5, 10>}, {pipeline_mode = #tpu.pipeline_mode<synchronous>, transform_indices = @transform_8, window_bounds = array<i64: 160, 80>}, {pipeline_mode = #tpu.pipeline_mode<synchronous>, transform_indices = @transform_9, window_bounds = array<i64: 5, 80, 120>}, {pipeline_mode = #tpu.pipeline_mode<synchronous>, transform_indices = @transform_10, window_bounds = array<i64: 1, 120>}, {pipeline_mode = #tpu.pipeline_mode<synchronous>, transform_indices = @transform_11, window_bounds = array<i64: 120, 84>}, {pipeline_mode = #tpu.pipeline_mode<synchronous>, transform_indices = @transform_12, window_bounds = array<i64: 1, 84>}, {pipeline_mode = #tpu.pipeline_mode<synchronous>, transform_indices = @transform_13, window_bounds = array<i64: 84, 10>}, {pipeline_mode = #tpu.pipeline_mode<synchronous>, transform_indices = @transform_14, window_bounds = array<i64: 1, 10>}, {transform_indices = @transform_15, window_bounds = array<i64: 1, 1, 10>}]} {
    %cst = arith.constant 0.000000e+00 : f32
    %0 = vector.broadcast %cst : f32 to vector<28x168xf32>
    %c0 = arith.constant 0 : index
    %c0_0 = arith.constant 0 : index
    %c0_1 = arith.constant 0 : index
    %1 = vector.load %arg1[%c0, %c0_0, %c0_1] : memref<1x32x32xf32, #tpu.memory_space<vmem>>, vector<1x28x32xf32>
    %2 = vector.shape_cast %1 : vector<1x28x32xf32> to vector<28x32xf32>
    %c0_2 = arith.constant 0 : index
    %c0_3 = arith.constant 0 : index
    %c0_4 = arith.constant 0 : index
    %3 = vector.load %arg2[%c0_2, %c0_3, %c0_4] : memref<5x32x168xf32, #tpu.memory_space<vmem>>, vector<1x32x168xf32>
    %4 = vector.shape_cast %3 : vector<1x32x168xf32> to vector<32x168xf32>
    %cst_5 = arith.constant dense<0.000000e+00> : vector<28x168xf32>
    %5 = tpu.matmul %2, %4, %cst_5 {dimension_numbers = #tpu.dot_dimension_numbers<[1], [0], [0], [1], [0, 0, 1, 1], [], []>} : vector<28x32xf32>, vector<32x168xf32>, vector<28x168xf32> -> vector<28x168xf32>
    %6 = arith.addf %0, %5 : vector<28x168xf32>
    %c0_6 = arith.constant 0 : index
    %c1 = arith.constant 1 : index
    %c0_7 = arith.constant 0 : index
    %7 = vector.load %arg1[%c0_6, %c1, %c0_7] : memref<1x32x32xf32, #tpu.memory_space<vmem>>, vector<1x28x32xf32>
    %8 = vector.shape_cast %7 : vector<1x28x32xf32> to vector<28x32xf32>
    %c1_8 = arith.constant 1 : index
    %c0_9 = arith.constant 0 : index
    %c0_10 = arith.constant 0 : index
    %9 = vector.load %arg2[%c1_8, %c0_9, %c0_10] : memref<5x32x168xf32, #tpu.memory_space<vmem>>, vector<1x32x168xf32>
    %10 = vector.shape_cast %9 : vector<1x32x168xf32> to vector<32x168xf32>
    %cst_11 = arith.constant dense<0.000000e+00> : vector<28x168xf32>
    %11 = tpu.matmul %8, %10, %cst_11 {dimension_numbers = #tpu.dot_dimension_numbers<[1], [0], [0], [1], [0, 0, 1, 1], [], []>} : vector<28x32xf32>, vector<32x168xf32>, vector<28x168xf32> -> vector<28x168xf32>
    %12 = arith.addf %6, %11 : vector<28x168xf32>
    %c0_12 = arith.constant 0 : index
    %c2 = arith.constant 2 : index
    %c0_13 = arith.constant 0 : index
    %13 = vector.load %arg1[%c0_12, %c2, %c0_13] : memref<1x32x32xf32, #tpu.memory_space<vmem>>, vector<1x28x32xf32>
    %14 = vector.shape_cast %13 : vector<1x28x32xf32> to vector<28x32xf32>
    %c2_14 = arith.constant 2 : index
    %c0_15 = arith.constant 0 : index
    %c0_16 = arith.constant 0 : index
    %15 = vector.load %arg2[%c2_14, %c0_15, %c0_16] : memref<5x32x168xf32, #tpu.memory_space<vmem>>, vector<1x32x168xf32>
    %16 = vector.shape_cast %15 : vector<1x32x168xf32> to vector<32x168xf32>
    %cst_17 = arith.constant dense<0.000000e+00> : vector<28x168xf32>
    %17 = tpu.matmul %14, %16, %cst_17 {dimension_numbers = #tpu.dot_dimension_numbers<[1], [0], [0], [1], [0, 0, 1, 1], [], []>} : vector<28x32xf32>, vector<32x168xf32>, vector<28x168xf32> -> vector<28x168xf32>
    %18 = arith.addf %12, %17 : vector<28x168xf32>
    %c0_18 = arith.constant 0 : index
    %c3 = arith.constant 3 : index
    %c0_19 = arith.constant 0 : index
    %19 = vector.load %arg1[%c0_18, %c3, %c0_19] : memref<1x32x32xf32, #tpu.memory_space<vmem>>, vector<1x28x32xf32>
    %20 = vector.shape_cast %19 : vector<1x28x32xf32> to vector<28x32xf32>
    %c3_20 = arith.constant 3 : index
    %c0_21 = arith.constant 0 : index
    %c0_22 = arith.constant 0 : index
    %21 = vector.load %arg2[%c3_20, %c0_21, %c0_22] : memref<5x32x168xf32, #tpu.memory_space<vmem>>, vector<1x32x168xf32>
    %22 = vector.shape_cast %21 : vector<1x32x168xf32> to vector<32x168xf32>
    %cst_23 = arith.constant dense<0.000000e+00> : vector<28x168xf32>
    %23 = tpu.matmul %20, %22, %cst_23 {dimension_numbers = #tpu.dot_dimension_numbers<[1], [0], [0], [1], [0, 0, 1, 1], [], []>} : vector<28x32xf32>, vector<32x168xf32>, vector<28x168xf32> -> vector<28x168xf32>
    %24 = arith.addf %18, %23 : vector<28x168xf32>
    %c0_24 = arith.constant 0 : index
    %c4 = arith.constant 4 : index
    %c0_25 = arith.constant 0 : index
    %25 = vector.load %arg1[%c0_24, %c4, %c0_25] : memref<1x32x32xf32, #tpu.memory_space<vmem>>, vector<1x28x32xf32>
    %26 = vector.shape_cast %25 : vector<1x28x32xf32> to vector<28x32xf32>
    %c4_26 = arith.constant 4 : index
    %c0_27 = arith.constant 0 : index
    %c0_28 = arith.constant 0 : index
    %27 = vector.load %arg2[%c4_26, %c0_27, %c0_28] : memref<5x32x168xf32, #tpu.memory_space<vmem>>, vector<1x32x168xf32>
    %28 = vector.shape_cast %27 : vector<1x32x168xf32> to vector<32x168xf32>
    %cst_29 = arith.constant dense<0.000000e+00> : vector<28x168xf32>
    %29 = tpu.matmul %26, %28, %cst_29 {dimension_numbers = #tpu.dot_dimension_numbers<[1], [0], [0], [1], [0, 0, 1, 1], [], []>} : vector<28x32xf32>, vector<32x168xf32>, vector<28x168xf32> -> vector<28x168xf32>
    %30 = arith.addf %24, %29 : vector<28x168xf32>
    %c0_30 = arith.constant 0 : index
    %c0_31 = arith.constant 0 : index
    %31 = vector.load %arg3[%c0_30, %c0_31] : memref<1x168xf32, #tpu.memory_space<vmem>>, vector<1x168xf32>
    %32 = vector.broadcast %31 : vector<1x168xf32> to vector<28x168xf32>
    %33 = arith.addf %30, %32 : vector<28x168xf32>
    %34 = math.tanh %33 : vector<28x168xf32>
    %c0_32 = arith.constant 0 : index
    %c0_33 = arith.constant 0 : index
    %35 = vector.load %arg4[%c0_32, %c0_33] : memref<14x28xf32, #tpu.memory_space<vmem>>, vector<14x28xf32>
    %c0_34 = arith.constant 0 : index
    %c0_35 = arith.constant 0 : index
    %36 = vector.load %arg5[%c0_34, %c0_35] : memref<168x84xf32, #tpu.memory_space<vmem>>, vector<168x84xf32>
    %cst_36 = arith.constant dense<0.000000e+00> : vector<28x84xf32>
    %37 = tpu.matmul %34, %36, %cst_36 {dimension_numbers = #tpu.dot_dimension_numbers<[1], [0], [0], [1], [0, 0, 1, 1], [], []>} : vector<28x168xf32>, vector<168x84xf32>, vector<28x84xf32> -> vector<28x84xf32>
    %cst_37 = arith.constant dense<0.000000e+00> : vector<14x84xf32>
    %38 = tpu.matmul %35, %37, %cst_37 {dimension_numbers = #tpu.dot_dimension_numbers<[1], [0], [0], [1], [0, 0, 1, 1], [], []>} : vector<14x28xf32>, vector<28x84xf32>, vector<14x84xf32> -> vector<14x84xf32>
    %c0_38 = arith.constant 0 : index
    %c0_39 = arith.constant 0 : index
    %39 = vector.load %arg17[%c0_38, %c0_39] : memref<14x84xf32, #tpu.memory_space<vmem>>, vector<14x84xf32>
    tpu.vector_store %arg17[%c0_38, %c0_39], %38 {strides = array<i32>} : memref<14x84xf32, #tpu.memory_space<vmem>>, vector<14x84xf32>,
    %cst_40 = arith.constant 0.000000e+00 : f32
    %40 = vector.broadcast %cst_40 : f32 to vector<10x160xf32>
    %c0_41 = arith.constant 0 : index
    %c0_42 = arith.constant 0 : index
    %41 = vector.load %arg17[%c0_41, %c0_42] : memref<14x84xf32, #tpu.memory_space<vmem>>, vector<10x84xf32>
    %c0_43 = arith.constant 0 : index
    %c0_44 = arith.constant 0 : index
    %c0_45 = arith.constant 0 : index
    %42 = vector.load %arg6[%c0_43, %c0_44, %c0_45] : memref<5x84x160xf32, #tpu.memory_space<vmem>>, vector<1x84x160xf32>
    %43 = vector.shape_cast %42 : vector<1x84x160xf32> to vector<84x160xf32>
    %cst_46 = arith.constant dense<0.000000e+00> : vector<10x160xf32>
    %44 = tpu.matmul %41, %43, %cst_46 {dimension_numbers = #tpu.dot_dimension_numbers<[1], [0], [0], [1], [0, 0, 1, 1], [], []>} : vector<10x84xf32>, vector<84x160xf32>, vector<10x160xf32> -> vector<10x160xf32>
    %45 = arith.addf %40, %44 : vector<10x160xf32>
    %c1_47 = arith.constant 1 : index
    %c0_48 = arith.constant 0 : index
    %46 = vector.load %arg17[%c1_47, %c0_48] : memref<14x84xf32, #tpu.memory_space<vmem>>, vector<10x84xf32>
    %c1_49 = arith.constant 1 : index
    %c0_50 = arith.constant 0 : index
    %c0_51 = arith.constant 0 : index
    %47 = vector.load %arg6[%c1_49, %c0_50, %c0_51] : memref<5x84x160xf32, #tpu.memory_space<vmem>>, vector<1x84x160xf32>
    %48 = vector.shape_cast %47 : vector<1x84x160xf32> to vector<84x160xf32>
    %cst_52 = arith.constant dense<0.000000e+00> : vector<10x160xf32>
    %49 = tpu.matmul %46, %48, %cst_52 {dimension_numbers = #tpu.dot_dimension_numbers<[1], [0], [0], [1], [0, 0, 1, 1], [], []>} : vector<10x84xf32>, vector<84x160xf32>, vector<10x160xf32> -> vector<10x160xf32>
    %50 = arith.addf %45, %49 : vector<10x160xf32>
    %c2_53 = arith.constant 2 : index
    %c0_54 = arith.constant 0 : index
    %51 = vector.load %arg17[%c2_53, %c0_54] : memref<14x84xf32, #tpu.memory_space<vmem>>, vector<10x84xf32>
    %c2_55 = arith.constant 2 : index
    %c0_56 = arith.constant 0 : index
    %c0_57 = arith.constant 0 : index
    %52 = vector.load %arg6[%c2_55, %c0_56, %c0_57] : memref<5x84x160xf32, #tpu.memory_space<vmem>>, vector<1x84x160xf32>
    %53 = vector.shape_cast %52 : vector<1x84x160xf32> to vector<84x160xf32>
    %cst_58 = arith.constant dense<0.000000e+00> : vector<10x160xf32>
    %54 = tpu.matmul %51, %53, %cst_58 {dimension_numbers = #tpu.dot_dimension_numbers<[1], [0], [0], [1], [0, 0, 1, 1], [], []>} : vector<10x84xf32>, vector<84x160xf32>, vector<10x160xf32> -> vector<10x160xf32>
    %55 = arith.addf %50, %54 : vector<10x160xf32>
    %c3_59 = arith.constant 3 : index
    %c0_60 = arith.constant 0 : index
    %56 = vector.load %arg17[%c3_59, %c0_60] : memref<14x84xf32, #tpu.memory_space<vmem>>, vector<10x84xf32>
    %c3_61 = arith.constant 3 : index
    %c0_62 = arith.constant 0 : index
    %c0_63 = arith.constant 0 : index
    %57 = vector.load %arg6[%c3_61, %c0_62, %c0_63] : memref<5x84x160xf32, #tpu.memory_space<vmem>>, vector<1x84x160xf32>
    %58 = vector.shape_cast %57 : vector<1x84x160xf32> to vector<84x160xf32>
    %cst_64 = arith.constant dense<0.000000e+00> : vector<10x160xf32>
    %59 = tpu.matmul %56, %58, %cst_64 {dimension_numbers = #tpu.dot_dimension_numbers<[1], [0], [0], [1], [0, 0, 1, 1], [], []>} : vector<10x84xf32>, vector<84x160xf32>, vector<10x160xf32> -> vector<10x160xf32>
    %60 = arith.addf %55, %59 : vector<10x160xf32>
    %c4_65 = arith.constant 4 : index
    %c0_66 = arith.constant 0 : index
    %61 = vector.load %arg17[%c4_65, %c0_66] : memref<14x84xf32, #tpu.memory_space<vmem>>, vector<10x84xf32>
    %c4_67 = arith.constant 4 : index
    %c0_68 = arith.constant 0 : index
    %c0_69 = arith.constant 0 : index
    %62 = vector.load %arg6[%c4_67, %c0_68, %c0_69] : memref<5x84x160xf32, #tpu.memory_space<vmem>>, vector<1x84x160xf32>
    %63 = vector.shape_cast %62 : vector<1x84x160xf32> to vector<84x160xf32>
    %cst_70 = arith.constant dense<0.000000e+00> : vector<10x160xf32>
    %64 = tpu.matmul %61, %63, %cst_70 {dimension_numbers = #tpu.dot_dimension_numbers<[1], [0], [0], [1], [0, 0, 1, 1], [], []>} : vector<10x84xf32>, vector<84x160xf32>, vector<10x160xf32> -> vector<10x160xf32>
    %65 = arith.addf %60, %64 : vector<10x160xf32>
    %c0_71 = arith.constant 0 : index
    %c0_72 = arith.constant 0 : index
    %66 = vector.load %arg7[%c0_71, %c0_72] : memref<1x160xf32, #tpu.memory_space<vmem>>, vector<1x160xf32>
    %67 = vector.broadcast %66 : vector<1x160xf32> to vector<10x160xf32>
    %68 = arith.addf %65, %67 : vector<10x160xf32>
    %69 = math.tanh %68 : vector<10x160xf32>
    %c0_73 = arith.constant 0 : index
    %c0_74 = arith.constant 0 : index
    %70 = vector.load %arg8[%c0_73, %c0_74] : memref<5x10xf32, #tpu.memory_space<vmem>>, vector<5x10xf32>
    %c0_75 = arith.constant 0 : index
    %c0_76 = arith.constant 0 : index
    %71 = vector.load %arg9[%c0_75, %c0_76] : memref<160x80xf32, #tpu.memory_space<vmem>>, vector<160x80xf32>
    %cst_77 = arith.constant dense<0.000000e+00> : vector<10x80xf32>
    %72 = tpu.matmul %69, %71, %cst_77 {dimension_numbers = #tpu.dot_dimension_numbers<[1], [0], [0], [1], [0, 0, 1, 1], [], []>} : vector<10x160xf32>, vector<160x80xf32>, vector<10x80xf32> -> vector<10x80xf32>
    %cst_78 = arith.constant dense<0.000000e+00> : vector<5x80xf32>
    %73 = tpu.matmul %70, %72, %cst_78 {dimension_numbers = #tpu.dot_dimension_numbers<[1], [0], [0], [1], [0, 0, 1, 1], [], []>} : vector<5x10xf32>, vector<10x80xf32>, vector<5x80xf32> -> vector<5x80xf32>
    %c0_79 = arith.constant 0 : index
    %c0_80 = arith.constant 0 : index
    %74 = vector.load %arg18[%c0_79, %c0_80] : memref<5x80xf32, #tpu.memory_space<vmem>>, vector<5x80xf32>
    tpu.vector_store %arg18[%c0_79, %c0_80], %73 {strides = array<i32>} : memref<5x80xf32, #tpu.memory_space<vmem>>, vector<5x80xf32>,
    %cst_81 = arith.constant 0.000000e+00 : f32
    %75 = vector.broadcast %cst_81 : f32 to vector<1x120xf32>
    %c0_82 = arith.constant 0 : index
    %c0_83 = arith.constant 0 : index
    %76 = vector.load %arg18[%c0_82, %c0_83] : memref<5x80xf32, #tpu.memory_space<vmem>>, vector<1x80xf32>
    %c0_84 = arith.constant 0 : index
    %c0_85 = arith.constant 0 : index
    %c0_86 = arith.constant 0 : index
    %77 = vector.load %arg10[%c0_84, %c0_85, %c0_86] : memref<5x80x120xf32, #tpu.memory_space<vmem>>, vector<1x80x120xf32>
    %78 = vector.shape_cast %77 : vector<1x80x120xf32> to vector<80x120xf32>
    %cst_87 = arith.constant dense<0.000000e+00> : vector<1x120xf32>
    %79 = tpu.matmul %76, %78, %cst_87 {dimension_numbers = #tpu.dot_dimension_numbers<[1], [0], [0], [1], [0, 0, 1, 1], [], []>} : vector<1x80xf32>, vector<80x120xf32>, vector<1x120xf32> -> vector<1x120xf32>
    %80 = arith.addf %75, %79 : vector<1x120xf32>
    %c1_88 = arith.constant 1 : index
    %c0_89 = arith.constant 0 : index
    %81 = vector.load %arg18[%c1_88, %c0_89] : memref<5x80xf32, #tpu.memory_space<vmem>>, vector<1x80xf32>
    %c1_90 = arith.constant 1 : index
    %c0_91 = arith.constant 0 : index
    %c0_92 = arith.constant 0 : index
    %82 = vector.load %arg10[%c1_90, %c0_91, %c0_92] : memref<5x80x120xf32, #tpu.memory_space<vmem>>, vector<1x80x120xf32>
    %83 = vector.shape_cast %82 : vector<1x80x120xf32> to vector<80x120xf32>
    %cst_93 = arith.constant dense<0.000000e+00> : vector<1x120xf32>
    %84 = tpu.matmul %81, %83, %cst_93 {dimension_numbers = #tpu.dot_dimension_numbers<[1], [0], [0], [1], [0, 0, 1, 1], [], []>} : vector<1x80xf32>, vector<80x120xf32>, vector<1x120xf32> -> vector<1x120xf32>
    %85 = arith.addf %80, %84 : vector<1x120xf32>
    %c2_94 = arith.constant 2 : index
    %c0_95 = arith.constant 0 : index
    %86 = vector.load %arg18[%c2_94, %c0_95] : memref<5x80xf32, #tpu.memory_space<vmem>>, vector<1x80xf32>
    %c2_96 = arith.constant 2 : index
    %c0_97 = arith.constant 0 : index
    %c0_98 = arith.constant 0 : index
    %87 = vector.load %arg10[%c2_96, %c0_97, %c0_98] : memref<5x80x120xf32, #tpu.memory_space<vmem>>, vector<1x80x120xf32>
    %88 = vector.shape_cast %87 : vector<1x80x120xf32> to vector<80x120xf32>
    %cst_99 = arith.constant dense<0.000000e+00> : vector<1x120xf32>
    %89 = tpu.matmul %86, %88, %cst_99 {dimension_numbers = #tpu.dot_dimension_numbers<[1], [0], [0], [1], [0, 0, 1, 1], [], []>} : vector<1x80xf32>, vector<80x120xf32>, vector<1x120xf32> -> vector<1x120xf32>
    %90 = arith.addf %85, %89 : vector<1x120xf32>
    %c3_100 = arith.constant 3 : index
    %c0_101 = arith.constant 0 : index
    %91 = vector.load %arg18[%c3_100, %c0_101] : memref<5x80xf32, #tpu.memory_space<vmem>>, vector<1x80xf32>
    %c3_102 = arith.constant 3 : index
    %c0_103 = arith.constant 0 : index
    %c0_104 = arith.constant 0 : index
    %92 = vector.load %arg10[%c3_102, %c0_103, %c0_104] : memref<5x80x120xf32, #tpu.memory_space<vmem>>, vector<1x80x120xf32>
    %93 = vector.shape_cast %92 : vector<1x80x120xf32> to vector<80x120xf32>
    %cst_105 = arith.constant dense<0.000000e+00> : vector<1x120xf32>
    %94 = tpu.matmul %91, %93, %cst_105 {dimension_numbers = #tpu.dot_dimension_numbers<[1], [0], [0], [1], [0, 0, 1, 1], [], []>} : vector<1x80xf32>, vector<80x120xf32>, vector<1x120xf32> -> vector<1x120xf32>
    %95 = arith.addf %90, %94 : vector<1x120xf32>
    %c4_106 = arith.constant 4 : index
    %c0_107 = arith.constant 0 : index
    %96 = vector.load %arg18[%c4_106, %c0_107] : memref<5x80xf32, #tpu.memory_space<vmem>>, vector<1x80xf32>
    %c4_108 = arith.constant 4 : index
    %c0_109 = arith.constant 0 : index
    %c0_110 = arith.constant 0 : index
    %97 = vector.load %arg10[%c4_108, %c0_109, %c0_110] : memref<5x80x120xf32, #tpu.memory_space<vmem>>, vector<1x80x120xf32>
    %98 = vector.shape_cast %97 : vector<1x80x120xf32> to vector<80x120xf32>
    %cst_111 = arith.constant dense<0.000000e+00> : vector<1x120xf32>
    %99 = tpu.matmul %96, %98, %cst_111 {dimension_numbers = #tpu.dot_dimension_numbers<[1], [0], [0], [1], [0, 0, 1, 1], [], []>} : vector<1x80xf32>, vector<80x120xf32>, vector<1x120xf32> -> vector<1x120xf32>
    %100 = arith.addf %95, %99 : vector<1x120xf32>
    %c0_112 = arith.constant 0 : index
    %c0_113 = arith.constant 0 : index
    %101 = vector.load %arg11[%c0_112, %c0_113] : memref<1x120xf32, #tpu.memory_space<vmem>>, vector<1x120xf32>
    %102 = arith.addf %100, %101 : vector<1x120xf32>
    %103 = math.tanh %102 : vector<1x120xf32>
    %c0_114 = arith.constant 0 : index
    %c0_115 = arith.constant 0 : index
    %104 = vector.load %arg12[%c0_114, %c0_115] : memref<120x84xf32, #tpu.memory_space<vmem>>, vector<120x84xf32>
    %cst_116 = arith.constant dense<0.000000e+00> : vector<1x84xf32>
    %105 = tpu.matmul %103, %104, %cst_116 {dimension_numbers = #tpu.dot_dimension_numbers<[1], [0], [0], [1], [0, 0, 1, 1], [], []>} : vector<1x120xf32>, vector<120x84xf32>, vector<1x84xf32> -> vector<1x84xf32>
    %c0_117 = arith.constant 0 : index
    %c0_118 = arith.constant 0 : index
    %106 = vector.load %arg13[%c0_117, %c0_118] : memref<1x84xf32, #tpu.memory_space<vmem>>, vector<1x84xf32>
    %107 = arith.addf %105, %106 : vector<1x84xf32>
    %108 = math.tanh %107 : vector<1x84xf32>
    %c0_119 = arith.constant 0 : index
    %c0_120 = arith.constant 0 : index
    %109 = vector.load %arg14[%c0_119, %c0_120] : memref<84x10xf32, #tpu.memory_space<vmem>>, vector<84x10xf32>
    %cst_121 = arith.constant dense<0.000000e+00> : vector<1x10xf32>
    %110 = tpu.matmul %108, %109, %cst_121 {dimension_numbers = #tpu.dot_dimension_numbers<[1], [0], [0], [1], [0, 0, 1, 1], [], []>} : vector<1x84xf32>, vector<84x10xf32>, vector<1x10xf32> -> vector<1x10xf32>
    %c0_122 = arith.constant 0 : index
    %c0_123 = arith.constant 0 : index
    %111 = vector.load %arg15[%c0_122, %c0_123] : memref<1x10xf32, #tpu.memory_space<vmem>>, vector<1x10xf32>
    %112 = arith.addf %110, %111 : vector<1x10xf32>
    %c0_124 = arith.constant 0 : index
    %c0_125 = arith.constant 0 : index
    %c0_126 = arith.constant 0 : index
    %113 = vector.load %arg16[%c0_124, %c0_125, %c0_126] : memref<1x1x10xf32, #tpu.memory_space<vmem>>, vector<1x1x10xf32>
    %114 = vector.shape_cast %113 : vector<1x1x10xf32> to vector<1x10xf32>
    %115 = vector.shape_cast %112 : vector<1x10xf32> to vector<1x1x10xf32>
    tpu.vector_store %arg16[%c0_124, %c0_125, %c0_126], %115 {strides = array<i32>} : memref<1x1x10xf32, #tpu.memory_space<vmem>>, vector<1x1x10xf32>,
    return
  }
  func.func @transform_0(%arg0: i32) -> (i32, i32, i32) {
    %c0_i32 = arith.constant 0 : i32
    %c0_i32_0 = arith.constant 0 : i32
    %c0_i32_1 = arith.constant 0 : i32
    return %arg0, %c0_i32, %c0_i32_0 : i32, i32, i32
  }
  func.func @transform_1(%arg0: i32) -> (i32, i32, i32) {
    %c0_i32 = arith.constant 0 : i32
    %c0_i32_0 = arith.constant 0 : i32
    %c0_i32_1 = arith.constant 0 : i32
    %c0_i32_2 = arith.constant 0 : i32
    return %c0_i32, %c0_i32_0, %c0_i32_1 : i32, i32, i32
  }
  func.func @transform_2(%arg0: i32) -> (i32, i32) {
    %c0_i32 = arith.constant 0 : i32
    %c0_i32_0 = arith.constant 0 : i32
    %c0_i32_1 = arith.constant 0 : i32
    return %c0_i32, %c0_i32_0 : i32, i32
  }
  func.func @transform_3(%arg0: i32) -> (i32, i32) {
    %c0_i32 = arith.constant 0 : i32
    %c0_i32_0 = arith.constant 0 : i32
    %c0_i32_1 = arith.constant 0 : i32
    return %c0_i32, %c0_i32_0 : i32, i32
  }
  func.func @transform_4(%arg0: i32) -> (i32, i32) {
    %c0_i32 = arith.constant 0 : i32
    %c0_i32_0 = arith.constant 0 : i32
    %c0_i32_1 = arith.constant 0 : i32
    return %c0_i32, %c0_i32_0 : i32, i32
  }
  func.func @transform_5(%arg0: i32) -> (i32, i32, i32) {
    %c0_i32 = arith.constant 0 : i32
    %c0_i32_0 = arith.constant 0 : i32
    %c0_i32_1 = arith.constant 0 : i32
    %c0_i32_2 = arith.constant 0 : i32
    return %c0_i32, %c0_i32_0, %c0_i32_1 : i32, i32, i32
  }
  func.func @transform_6(%arg0: i32) -> (i32, i32) {
    %c0_i32 = arith.constant 0 : i32
    %c0_i32_0 = arith.constant 0 : i32
    %c0_i32_1 = arith.constant 0 : i32
    return %c0_i32, %c0_i32_0 : i32, i32
  }
  func.func @transform_7(%arg0: i32) -> (i32, i32) {
    %c0_i32 = arith.constant 0 : i32
    %c0_i32_0 = arith.constant 0 : i32
    %c0_i32_1 = arith.constant 0 : i32
    return %c0_i32, %c0_i32_0 : i32, i32
  }
  func.func @transform_8(%arg0: i32) -> (i32, i32) {
    %c0_i32 = arith.constant 0 : i32
    %c0_i32_0 = arith.constant 0 : i32
    %c0_i32_1 = arith.constant 0 : i32
    return %c0_i32, %c0_i32_0 : i32, i32
  }
  func.func @transform_9(%arg0: i32) -> (i32, i32, i32) {
    %c0_i32 = arith.constant 0 : i32
    %c0_i32_0 = arith.constant 0 : i32
    %c0_i32_1 = arith.constant 0 : i32
    %c0_i32_2 = arith.constant 0 : i32
    return %c0_i32, %c0_i32_0, %c0_i32_1 : i32, i32, i32
  }
  func.func @transform_10(%arg0: i32) -> (i32, i32) {
    %c0_i32 = arith.constant 0 : i32
    %c0_i32_0 = arith.constant 0 : i32
    %c0_i32_1 = arith.constant 0 : i32
    return %c0_i32, %c0_i32_0 : i32, i32
  }
  func.func @transform_11(%arg0: i32) -> (i32, i32) {
    %c0_i32 = arith.constant 0 : i32
    %c0_i32_0 = arith.constant 0 : i32
    %c0_i32_1 = arith.constant 0 : i32
    return %c0_i32, %c0_i32_0 : i32, i32
  }
  func.func @transform_12(%arg0: i32) -> (i32, i32) {
    %c0_i32 = arith.constant 0 : i32
    %c0_i32_0 = arith.constant 0 : i32
    %c0_i32_1 = arith.constant 0 : i32
    return %c0_i32, %c0_i32_0 : i32, i32
  }
  func.func @transform_13(%arg0: i32) -> (i32, i32) {
    %c0_i32 = arith.constant 0 : i32
    %c0_i32_0 = arith.constant 0 : i32
    %c0_i32_1 = arith.constant 0 : i32
    return %c0_i32, %c0_i32_0 : i32, i32
  }
  func.func @transform_14(%arg0: i32) -> (i32, i32) {
    %c0_i32 = arith.constant 0 : i32
    %c0_i32_0 = arith.constant 0 : i32
    %c0_i32_1 = arith.constant 0 : i32
    return %c0_i32, %c0_i32_0 : i32, i32
  }
  func.func @transform_15(%arg0: i32) -> (i32, i32, i32) {
    %c0_i32 = arith.constant 0 : i32
    %c0_i32_0 = arith.constant 0 : i32
    %c0_i32_1 = arith.constant 0 : i32
    return %arg0, %c0_i32, %c0_i32_0 : i32, i32, i32
  }
}

</mosaic_0001>

<bundles_post_ra>
// kernel: lenet5_forward.1
= control target key start
LH: loop header
LB: loop body
LE: loop exit
PB: predicated region body
PF: predicated region fallthrough
CT: control target
= control target key end

     0   :  { %20 = vsyncpa [#allocation5], 0  ;;  %s4689_s0 = inlined_call_operand.vmem [shape: f32[2,32,32], index: 0, kind: input, shape index: {}]   ;;  %s4690_s1 = inlined_call_operand.vmem [shape: f32[5,32,168], index: 1, kind: input, shape index: {}]   ;;  %s4691_s2 = inlined_call_operand.vmem [shape: f32[1,168], index: 2, kind: input, shape index: {}]   ;;  %s4692_s3 = inlined_call_operand.vmem [shape: f32[14,28], index: 3, kind: input, shape index: {}]   ;;  %s4693_s4 = inlined_call_operand.vmem [shape: f32[168,84], index: 4, kind: input, shape index: {}]   ;;  %s4694_s5 = inlined_call_operand.vmem [shape: f32[5,84,160], index: 5, kind: input, shape index: {}]   ;;  %s4695_s6 = inlined_call_operand.vmem [shape: f32[1,160], index: 6, kind: input, shape index: {}]   ;;  %s4696_s7 = inlined_call_operand.vmem [shape: f32[5,10], index: 7, kind: input, shape index: {}]   ;;  %s4697_s8 = inlined_call_operand.vmem [shape: f32[160,80], index: 8, kind: input, shape index: {}]   ;;  %s4698_s9 = inlined_call_operand.vmem [shape: f32[5,80,120], index: 9, kind: input, shape index: {}]   ;;  %s4699_s10 = inlined_call_operand.vmem [shape: f32[1,120], index: 10, kind: input, shape index: {}]   ;;  %s4700_s11 = inlined_call_operand.vmem [shape: f32[120,84], index: 11, kind: input, shape index: {}]   ;;  %s4701_s12 = inlined_call_operand.vmem [shape: f32[1,84], index: 12, kind: input, shape index: {}]   ;;  %s4702_s13 = inlined_call_operand.vmem [shape: f32[84,10], index: 13, kind: input, shape index: {}]   ;;  %s4703_s14 = inlined_call_operand.vmem [shape: f32[1,10], index: 14, kind: input, shape index: {}]   ;;  %s4704_s15 = inlined_call_operand.hbm [shape: f32[2,1,10], index: 15, kind: output, shape index: {}]  }
   0x1   :  { %22 = vsyncpa [#allocation5 + $0x1], 0  ;;  %s3514_s18 = smov 0   ;;  %s3516_s19 = smov 0  }
   0x2   :  { %s3518_s20 = smov 0   ;;  %s3520_s21 = smov 0  }
   0x3 LB: > { %4710 = sst [smem:[#allocation7_spill]] %s3417_s18  ;;  %s3535_s22 = sadd.s32 4294967295, %s3429_s21   ;;  %s3429_s21 = sphi %s3520_s21, %s4719_s21   ;;  %s3425_s20 = sphi %s3518_s20, %s4721_s20   ;;  %s3421_s19 = sphi %s3516_s19, %s4723_s19   ;;  %s3417_s18 = sphi %s3514_s18, %s4722_s18  }
   0x4   : > { %4711 = sst [smem:[#allocation8_spill]] %s3425_s20  ;;  %s2788_s23 = sadd.s32 4294967294, %s3429_s21  }
   0x5   : > { %s3539_s24 = sadd.s32 1, %s3429_s21   ;;  %s355_s25 = sadd.s32 1, %s3425_s20 }
   0x6   : > { %4712 = sst [smem:[#allocation9_spill]] %s3539_s24  ;;  %s352_s26 = ssub.s32 %s3429_s21, %s3539_s24 }
   0x7   : > { %p365_p0 = scmp.ne.s32.totalorder %s3425_s20, %s3421_s19  ;;  %p353_p1 = scmp.eq.s32.totalorder %s352_s26, 0 }
   0x8   : > { %p366_p2 = scmp.eq.s32.totalorder %s3535_s22, 1  ;;  %p371_p3 = scmp.ne.s32.totalorder %s3421_s19, %s3417_s18 }
   0x9   : > { %p372_p4 = scmp.eq.s32.totalorder %s2788_s23, 1  ;;  %p2791_p7 = scmp.ge.s32.totalorder %s3429_s21, 1 }
   0xa   : > { %s3550_s27 = scalar_select %p353_p1, %s3425_s20, %s355_s25  }
   0xb   : > { %p3552_p5 = por %p366_p2, %p365_p0  ;;  %p3556_p6 = por %p372_p4, %p371_p3 }
   0xc   : > { %4713 = sst [smem:[#allocation10_spill]] %s3550_s27  ;;  %p440_p8 = scmp.lt.s32.totalorder %s3429_s21, 3 }
   0xd   : > { %s4715_s29 = scalar_select %p3556_p6, 1, 0 }
   0xe   : > { %p441_p9 = pnand %p2791_p7, %p440_p8 }
   0xf   : > { %4716 = sst [smem:[#allocation11_spill]] %s4715_s29  ;;  %p487_p10 = scmp.lt.s32.totalorder (!%p441_p9), %s3535_s22, 1 }
  0x10   : > { %444 = sbr.rel (%p441_p9) target bundleno = 2028 (0x7ec), region = 80  ;;  %s3013_s16 = sshll.u32 (!%p441_p9), %s3535_s22, 4 }
  0x11   : > { %s4654_s20 = scalar_lea.hbm (!%p441_p9), %s4704_s15, %s3013_s16 }
  0x15   : > { %v2801_v0 = vld [vmem:[%s4690_s1 + $0x78] sm:$0xff]  ;;  %v2800_v2 = vld [vmem:[%s4690_s1 + $0x70] sm:$0xff]  ;;  %v2799_v4 = vld [vmem:[%s4690_s1 + $0x68] sm:$0xff]  ;;  %s488_s24 = scalar_select %p487_p10, %s3535_s22, 1  ;;  %vm517_vm0 = vcmask 261120   ;;  %v3431_v18 = vmov 0.0  }
  0x16   : > { %v503_v1 = vld [vmem:[%s4690_s1 + $0x38] sm:$0xff]  ;;  %554 = vmatprep.subr.mxu0 %v2801_v0  ;;  %v502_v3 = vld [vmem:[%s4690_s1 + $0x30] sm:$0xff]  ;;  %v501_v5 = vld [vmem:[%s4690_s1 + $0x28] sm:$0xff]  ;;  %594 = vmatprep.mubr.f32.mxu0 %v3431_v18  ;;  %vm1137_vm1 = vcmask 326656   ;;  %vm1235_vm2 = vcmask 228352   ;;  %vm1242_vm3 = vcmask 1043456  }
  0x17   : > { %655 = vmatprep.subr.mxu1 %v503_v1  ;;  %555 = vmatpush1.msra.mxu0 %v2800_v2  ;;  %v2798_v6 = vld [vmem:[%s4690_s1 + $0x60] sm:$0xff]  ;;  %v2797_v8 = vld [vmem:[%s4690_s1 + $0x58] sm:$0xff]  ;;  %v2796_v10 = vld [vmem:[%s4690_s1 + $0x50] sm:$0xff]  ;;  %s3016_s30 = sshll.u32 %s488_s24, 5  ;;  %vm1323_vm4 = vcmask 685056   ;;  %vm1321_vm5 = vcmask 687104  }
  0x18   : > { %656 = vmatpush1.msra.mxu1 %v502_v3  ;;  %v500_v7 = vld [vmem:[%s4690_s1 + $0x20] sm:$0xff]  ;;  %556 = vmatprep.subr.mxu0 %v2799_v4  ;;  %v499_v9 = vld [vmem:[%s4690_s1 + $0x18] sm:$0xff]  ;;  %v498_v11 = vld [vmem:[%s4690_s1 + $0x10] sm:$0xff]  ;;  %s3612_s23 = scalar_lea.vmem %s4689_s0, %s3016_s30  ;;  %vm3432_vm6 = vmmov 0   ;;  %vm2032_vm7 = vcmask 1041408   ;;  %vm2028_vm8 = vcmask 80896  }
  0x19   : > { %657 = vmatprep.subr.mxu1 %v501_v5  ;;  %557 = vmatpush1.msra.mxu0 %v2798_v6  ;;  %v2795_v12 = vld [vmem:[%s4690_s1 + $0x48] sm:$0xff]  ;;  %v2794_v14 = vld [vmem:[%s4690_s1 + $0x40] sm:$0xff]  ;;  %v2817_v19 = vld [vmem:[%s4690_s1 + $0xb8] sm:$0xff]  ;;  %vm2106_vm9 = vcmask 651264   ;;  %vm2131_vm10 = vcmask 654336   ;;  %vm2555_vm11 = vcmask 982016  }
  0x1a   : > { %658 = vmatpush1.msra.mxu1 %v500_v7  ;;  %v497_v13 = vld [vmem:[%s4690_s1 + $0x8] sm:$0xff]  ;;  %558 = vmatprep.subr.mxu0 %v2797_v8  ;;  %v496_v15 = vld [vmem:[%s4690_s1] sm:$0xff]  ;;  %v2829_v20 = vld [vmem:[%s4690_s1 + $0xf8] sm:$0xff]  ;;  %vm2718_vm12 = vcmask 73728   ;;  %s3433_s22 = smov [#allocation4]  }
  0x1b   : > { %659 = vmatprep.subr.mxu1 %v499_v9  ;;  %559 = vmatpush1.msra.mxu0 %v2796_v10  ;;  %v504_v16 = vld [vmem:[%s3612_s23 + $0x1] sm:$0xff]  ;;  %v2816_v21 = vld [vmem:[%s4690_s1 + $0xb0] sm:$0xff]  ;;  %v2813_v31 = vld [vmem:[%s4690_s1 + $0x98] sm:$0xff]  ;;  %s3373_s29 = sshll.u32 %s3433_s22, 4  ;;  %s3374_s29 = int_to_ptr.vmem [resolvable:$false] %s3373_s29 }
  0x1c   : > { %660 = vmatpush1.msra.mxu1 %v498_v11  ;;  %560 = vmatprep.subr.mxu0 %v2795_v12  ;;  %v492_v17 = vld [vmem:[%s3612_s23] sm:$0xff]  ;;  %v2828_v22 = vld [vmem:[%s4690_s1 + $0xf0] sm:$0xff]  ;;  %v493_v24 = vld [vmem:[%s3612_s23 + $0x8] sm:$0xff]  ;;  %s3375_s18 = scalar_lea.vmem %s3374_s29, 32 }
  0x1d   : > { %661 = vmatprep.subr.mxu1 %v497_v13  ;;  %561 = vmatpush1.msra.mxu0 %v2794_v14  ;;  %v505_v23 = vld [vmem:[%s3612_s23 + $0x9] sm:$0xff]  ;;  %v2814_v27 = vld [vmem:[%s4690_s1 + $0xa0] sm:$0xff]  ;;  %v506_v29 = vld [vmem:[%s3612_s23 + $0x11] sm:$0xff] }
  0x1e   : > { %662 = vmatpush1.msra.mxu1 %v496_v15  ;;  %695 = vmatprep.mubr.f32.mxu1 %v3431_v18  ;;  %v2815_v25 = vld [vmem:[%s4690_s1 + $0xa8] sm:$0xff]  ;;  %v2826_v28 = vld [vmem:[%s4690_s1 + $0xe0] sm:$0xff]  ;;  %v494_v30 = vld [vmem:[%s3612_s23 + $0x10] sm:$0xff] }
  0x1f   : > { %2802 = vmatmul.mubr.msk.f32.vlgmr.msra.gmra.mxu0 %vm517_vm0, %v504_v16  ;;  %2806 = vmatmul.mubr.msk.f32.vlgmr.msra.gmra.mxu1 %vm517_vm0, %v492_v17  ;;  %v2827_v26 = vld [vmem:[%s4690_s1 + $0xe8] sm:$0xff]  ;;  %v2825_v32 = vld [vmem:[%s4690_s1 + $0xd8] sm:$0xff]  ;;  %v2812_v33 = vld [vmem:[%s4690_s1 + $0x90] sm:$0xff] }
  0x20   : > { %600 = vmatprep.mubr.f32.mxu0 %v3431_v18  ;;  %701 = vmatprep.mubr.f32.mxu1 %v3431_v18  ;;  %v2824_v34 = vld [vmem:[%s4690_s1 + $0xd0] sm:$0xff]  ;;  %v507_v35 = vld [vmem:[%s3612_s23 + $0x19] sm:$0xf]  ;;  %v2811_v37 = vld [vmem:[%s4690_s1 + $0x88] sm:$0xff] }
  0x21   : > { %769 = vmatprep.subr.mxu0 %v2817_v19  ;;  %891 = vmatprep.subr.mxu1 %v2829_v20  ;;  %v495_v36 = vld [vmem:[%s3612_s23 + $0x18] sm:$0xf]  ;;  %v2810_v38 = vld [vmem:[%s4690_s1 + $0x80] sm:$0xff]  ;;  %v2823_v39 = vld [vmem:[%s4690_s1 + $0xc8] sm:$0xff] }
  0x22   : > { %770 = vmatpush1.msra.mxu0 %v2816_v21  ;;  %892 = vmatpush1.msra.mxu1 %v2828_v22  ;;  %v2822_v40 = vld [vmem:[%s4690_s1 + $0xc0] sm:$0xff]  ;;  %v2841_v43 = vld [vmem:[%s4690_s1 + $0x138] sm:$0xff]  ;;  %v2840_v44 = vld [vmem:[%s4690_s1 + $0x130] sm:$0xff] }
  0x23   : > { %2803 = vmatmul.mubr.msk.f32.gmra.mxu0 %vm517_vm0, %v505_v23  ;;  %2807 = vmatmul.mubr.msk.f32.gmra.mxu1 %vm517_vm0, %v493_v24  ;;  %v720_v41 = vld [vmem:[%s3612_s23 + $0x2] sm:$0xff]  ;;  %v721_v45 = vld [vmem:[%s3612_s23 + $0xa] sm:$0xff]  ;;  %v722_v49 = vld [vmem:[%s3612_s23 + $0x12] sm:$0xff] }
  0x24   : > { %606 = vmatprep.mubr.f32.mxu0 %v3431_v18  ;;  %707 = vmatprep.mubr.f32.mxu1 %v3431_v18  ;;  %v842_v42 = vld [vmem:[%s3612_s23 + $0x3] sm:$0xff]  ;;  %v843_v46 = vld [vmem:[%s3612_s23 + $0xb] sm:$0xff]  ;;  %v844_v50 = vld [vmem:[%s3612_s23 + $0x13] sm:$0xff] }
  0x25   : > { %771 = vmatprep.subr.mxu0 %v2815_v25  ;;  %893 = vmatprep.subr.mxu1 %v2827_v26  ;;  %v2839_v47 = vld [vmem:[%s4690_s1 + $0x128] sm:$0xff]  ;;  %v2838_v48 = vld [vmem:[%s4690_s1 + $0x120] sm:$0xff]  ;;  %v2837_v51 = vld [vmem:[%s4690_s1 + $0x118] sm:$0xff] }
  0x26   : > { %772 = vmatpush1.msra.mxu0 %v2814_v27  ;;  %894 = vmatpush1.msra.mxu1 %v2826_v28  ;;  %v2836_v52 = vld [vmem:[%s4690_s1 + $0x110] sm:$0xff]  ;;  %v2835_v53 = vld [vmem:[%s4690_s1 + $0x108] sm:$0xff]  ;;  %v723_v54 = vld [vmem:[%s3612_s23 + $0x1a] sm:$0xf] }
  0x27   : > { %2804 = vmatmul.mubr.msk.f32.gmra.mxu0 %vm517_vm0, %v506_v29  ;;  %2808 = vmatmul.mubr.msk.f32.gmra.mxu1 %vm517_vm0, %v494_v30  ;;  %v845_v55 = vld [vmem:[%s3612_s23 + $0x1b] sm:$0xf]  ;;  %v2834_v56 = vld [vmem:[%s4690_s1 + $0x100] sm:$0xff]  ;;  %v965_v58 = vld [vmem:[%s3612_s23 + $0xc] sm:$0xff] }
  0x28   : > { %612 = vmatprep.mubr.f32.mxu0 %v3431_v18  ;;  %713 = vmatprep.mubr.f32.mxu1 %v3431_v18  ;;  %v964_v57 = vld [vmem:[%s3612_s23 + $0x4] sm:$0xff]  ;;  %v966_v59 = vld [vmem:[%s3612_s23 + $0x14] sm:$0xff]  ;;  %v967_v60 = vld [vmem:[%s3612_s23 + $0x1c] sm:$0xf]  ;;  %s485_s23 = sand.u32 1, %s3421_s19  }
  0x29   : > { %773 = vmatprep.subr.mxu0 %v2813_v31  ;;  %895 = vmatprep.subr.mxu1 %v2825_v32  ;;  %v1131_v61 = vld [vmem:[%s4693_s4 + $0x78] sm:$0xff]  ;;  %v1130_v62 = vld [vmem:[%s4693_s4 + $0x70] sm:$0xff]  ;;  %v1129_v63 = vld [vmem:[%s4693_s4 + $0x68] sm:$0xff]  ;;  %s486_s17 = scalar_lea.vmem [#allocation4], %s485_s23  ;;  %s2721_s27 = scalar_lea.sflag [#allocation5], %s485_s23 }
  0x2a   : > { %774 = vmatpush1.msra.mxu0 %v2812_v33  ;;  %896 = vmatpush1.msra.mxu1 %v2824_v34  ;;  %v1128_v0 = vld [vmem:[%s4693_s4 + $0x60] sm:$0xff]  ;;  %v1127_v1 = vld [vmem:[%s4693_s4 + $0x58] sm:$0xff]  ;;  %v1126_v2 = vld [vmem:[%s4693_s4 + $0x50] sm:$0xff]  ;;  %s2733_s25 = sshll.u32 %s486_s17, 4  ;;  %s2734_s25 = int_to_ptr.vmem [resolvable:$true] %s2733_s25 }
  0x2b   : > { %2805 = vmatmul.mubr.msk.f32.gmra.mxu0 %vm517_vm0, %v507_v35  ;;  %2809 = vmatmul.mubr.msk.f32.gmra.mxu1 %vm517_vm0, %v495_v36  ;;  %v1125_v3 = vld [vmem:[%s4693_s4 + $0x48] sm:$0xff]  ;;  %v1124_v4 = vld [vmem:[%s4693_s4 + $0x40] sm:$0xff]  ;;  %v1123_v5 = vld [vmem:[%s4693_s4 + $0x38] sm:$0xff]  ;;  %s3369_s30 = scalar_lea.vmem %s2734_s25, 16  ;;  %p3376_p0 = scmp.lt.s32.totalorder %s2734_s25, %s3374_s29 }
  0x2c   : > { %775 = vmatprep.subr.mxu0 %v2811_v37  ;;  %809 = vmatprep.mubr.f32.mxu0 %v3431_v18  ;;  %v1122_v6 = vld [vmem:[%s4693_s4 + $0x30] sm:$0xff]  ;;  %v1121_v7 = vld [vmem:[%s4693_s4 + $0x28] sm:$0xff]  ;;  %v1120_v8 = vld [vmem:[%s4693_s4 + $0x20] sm:$0xff]  ;;  %p3370_p11 = scmp.ne.s32.totalorder %s2734_s25, %s3369_s30  ;;  %p3377_p1 = scmp.lt.s32.totalorder %s3375_s18, %s3369_s30 }
  0x2d   : > { %776 = vmatpush1.msra.mxu0 %v2810_v38  ;;  %897 = vmatprep.subr.mxu1 %v2823_v39  ;;  %v1119_v9 = vld [vmem:[%s4693_s4 + $0x18] sm:$0xff]  ;;  %v1118_v10 = vld [vmem:[%s4693_s4 + $0x10] sm:$0xff]  ;;  %v1117_v11 = vld [vmem:[%s4693_s4 + $0x8] sm:$0xff] }
  0x2e   : > { %898 = vmatpush1.msra.mxu1 %v2822_v40  ;;  %931 = vmatprep.mubr.f32.mxu1 %v3431_v18  ;;  %v1116_v12 = vld [vmem:[%s4693_s4] sm:$0xff]  ;;  %v1135_v14 = vld [vmem:[%s4693_s4 + $0x98] sm:$0xff]  ;;  %v1134_v15 = vld [vmem:[%s4693_s4 + $0x90] sm:$0xff]  ;;  %v1088_v40 = vlaneseq  ;;  %p3371_p12 = pnand %p3370_p11, %p3552_p5  ;;  %p3378_p2 = por %p3377_p1, %p3376_p0 }
  0x2f   : > { %2818 = vmatmul.mubr.msk.f32.vlgmr.msra.gmra.mxu0 %vm517_vm0, %v720_v41  ;;  %2830 = vmatmul.mubr.msk.f32.vlgmr.msra.gmra.mxu1 %vm517_vm0, %v842_v42  ;;  %v1136_v13 = vld [vmem:[%s4693_s4 + $0xa0] sm:$0xff]  ;;  %v1133_v16 = vld [vmem:[%s4693_s4 + $0x88] sm:$0xff] }
  0x30   : > { %815 = vmatprep.mubr.f32.mxu0 %v3431_v18  ;;  %937 = vmatprep.mubr.f32.mxu1 %v3431_v18  ;;  %v1132_v17 = vld [vmem:[%s4693_s4 + $0x80] sm:$0xff]  ;;  %p3372_p13 = pneg %p3371_p12 }
  0x31   : > { %1013 = vmatprep.subr.mxu0 %v2841_v43  ;;  %1150 = vmatprep.subr.mxu1 %v3431_v18 }
  0x32   : > { %1014 = vmatpush1.msra.mxu0 %v2840_v44  ;;  %1151 = vmatpush1.msra.mxu1 %v1131_v61  ;;  %v3833_v44 = vshrl.u32 %v1088_v40, 7  ;;  %p3379_p3 = pnand %p3378_p2, %p3372_p13 }
  0x33   : > { %2819 = vmatmul.mubr.msk.f32.gmra.mxu0 %vm517_vm0, %v721_v45  ;;  %2831 = vmatmul.mubr.msk.f32.gmra.mxu1 %vm517_vm0, %v843_v46 }
  0x34   : > { %821 = vmatprep.mubr.f32.mxu0 %v3431_v18  ;;  %943 = vmatprep.mubr.f32.mxu1 %v3431_v18 }
  0x35   : > { %1015 = vmatprep.subr.mxu0 %v2839_v47  ;;  %1152 = vmatprep.subr.mxu1 %v3431_v18 }
  0x36   : > { %1016 = vmatpush1.msra.mxu0 %v2838_v48  ;;  %1153 = vmatpush1.msra.mxu1 %v1130_v62 }
  0x37   : > { %2820 = vmatmul.mubr.msk.f32.gmra.mxu0 %vm517_vm0, %v722_v49  ;;  %2832 = vmatmul.mubr.msk.f32.gmra.mxu1 %vm517_vm0, %v844_v50 }
  0x38   : > { %827 = vmatprep.mubr.f32.mxu0 %v3431_v18  ;;  %1017 = vmatprep.subr.mxu0 %v2837_v51  ;;  %v1090_v51 = vsub.s32 0, %v3833_v44 }
  0x39   : > { %949 = vmatprep.mubr.f32.mxu1 %v3431_v18  ;;  %1018 = vmatpush1.msra.mxu0 %v2836_v52  ;;  %v1094_v52 = vsub.s32 1, %v3833_v44 }
  0x3a   : > { %1019 = vmatprep.subr.mxu0 %v2835_v53  ;;  %1154 = vmatprep.subr.mxu1 %v3431_v18 }
  0x3b   : > { %2821 = vmatmul.mubr.msk.f32.gmra.mxu0 %vm517_vm0, %v723_v54  ;;  %2833 = vmatmul.mubr.msk.f32.gmra.mxu1 %vm517_vm0, %v845_v55  ;;  %v1086_v55 = vld [vmem:[%s4691_s2] sm:$0x3] }
  0x3c   : > { %1020 = vmatpush1.msra.mxu0 %v2834_v56  ;;  %1053 = vmatprep.mubr.f32.mxu0 %v3431_v18  ;;  %v1091_v62 = vrot.slane %v1086_v55, %v1090_v51 }
  0x3d   : > { %1155 = vmatpush1.msra.mxu1 %v1129_v63  ;;  %v1095_v63 = vrot.slane %v1086_v55, %v1094_v52  ;;  %v1348_v55 = vld [vmem:[%s4694_s5 + $0xa8] sm:$0xf] }
  0x3e   : > { %1156 = vmatprep.subr.mxu1 %v3431_v18 }
  0x3f   : > { %2842 = vmatmul.mubr.msk.f32.vlgmr.msra.gmra.mxu0 %vm517_vm0, %v964_v57  ;;  %1157 = vmatpush1.msra.mxu1 %v1128_v0 }
  0x40   : > { %1059 = vmatprep.mubr.f32.mxu0 %v3431_v18  ;;  %1158 = vmatprep.subr.mxu1 %v3431_v18 }
  0x41   : > { %1159 = vmatpush1.msra.mxu1 %v1127_v1 }
  0x42   : > { %1160 = vmatprep.subr.mxu1 %v3431_v18 }
  0x43   : > { %2843 = vmatmul.mubr.msk.f32.gmra.mxu0 %vm517_vm0, %v965_v58  ;;  %1161 = vmatpush1.msra.mxu1 %v1126_v2 }
  0x44   : > { %1065 = vmatprep.mubr.f32.mxu0 %v3431_v18  ;;  %1162 = vmatprep.subr.mxu1 %v3431_v18 }
  0x45   : > { %1163 = vmatpush1.msra.mxu1 %v1125_v3 }
  0x46   : > { %1164 = vmatprep.subr.mxu1 %v3431_v18 }
  0x47   : > { %2844 = vmatmul.mubr.msk.f32.gmra.mxu0 %vm517_vm0, %v966_v59  ;;  %1165 = vmatpush1.msra.mxu1 %v1124_v4 }
  0x48   : > { %1071 = vmatprep.mubr.f32.mxu0 %v3431_v18  ;;  %1166 = vmatprep.subr.mxu1 %v3431_v18 }
  0x49   : > { %1167 = vmatpush1.msra.mxu1 %v1123_v5 }
  0x4a   : > { %1168 = vmatprep.subr.mxu1 %v3431_v18 }
  0x4b   : > { %2845 = vmatmul.mubr.msk.f32.gmra.mxu0 %vm517_vm0, %v967_v60  ;;  %1169 = vmatpush1.msra.mxu1 %v1122_v6 }
  0x4c   : > { %1170 = vmatprep.subr.mxu1 %v3431_v18 }
  0x4d   : > { %1171 = vmatpush1.msra.mxu1 %v1121_v7 }
  0x4e   : > { %1172 = vmatprep.subr.mxu1 %v3431_v18 }
  0x4f   : > { %1173 = vmatpush1.msra.mxu1 %v1120_v8 }
  0x50   : > { %1174 = vmatprep.subr.mxu1 %v3431_v18 }
  0x51   : > { %1175 = vmatpush1.msra.mxu1 %v1119_v9 }
  0x52   : > { %1176 = vmatprep.subr.mxu1 %v3431_v18 }
  0x53   : > { %1177 = vmatpush1.msra.mxu1 %v1118_v10 }
  0x54   : > { %1178 = vmatprep.subr.mxu1 %v3431_v18 }
  0x55   : > { %1179 = vmatpush1.msra.mxu1 %v1117_v11 }
  0x56   : > { %1180 = vmatprep.subr.mxu1 %v3431_v18 }
  0x57   : > { %1181 = vmatpush1.msra.mxu1 %v1116_v12 }
  0x58   : > { %1204 = vmatprep.subr.mxu1 %v3431_v18 }
  0x59   : > { %1205 = vmatpush2.msra.mxu1 %v1136_v13 }
  0x5a   : > { %1206 = vmatprep.subr.mxu1 %v3431_v18 }
  0x5b   : > { %1207 = vmatpush2.msra.mxu1 %v1135_v14 }
  0x5c   : > { %1208 = vmatprep.subr.mxu1 %v3431_v18 }
  0x5d   : > { %1209 = vmatpush2.msra.mxu1 %v1134_v15 }
  0x5e   : > { %1210 = vmatprep.subr.mxu1 %v3431_v18 }
  0x5f   : > { %1211 = vmatpush2.msra.mxu1 %v1133_v16 }
  0x60   : > { %1212 = vmatprep.subr.mxu1 %v3431_v18 }
  0x61   : > { %1213 = vmatpush2.msra.mxu1 %v1132_v17 }
  0x62   : > { %2879 = vmatprep.subr.msk.mxu1 %vm1242_vm3, %v1348_v55 }
  0xdf   : > { %v596_v19 = vpop.f32.mrf.mxu0  ;;  %v697_v20 = vpop.f32.mrf.mxu1 }
  0xe0   : > { %v698_v45 = vadd.f32 %v697_v20, %v596_v19 }
  0xe1   : > { %v598_v21 = vpop.f32.mrf.mxu0  ;;  %v699_v22 = vpop.f32.mrf.mxu1 }
  0xe2   : > { %v700_v48 = vadd.f32 %v699_v22, %v598_v21 }
  0xe3   : > { %v602_v23 = vpop.f32.mrf.mxu0  ;;  %v703_v24 = vpop.f32.mrf.mxu1 }
  0xe4   : > { %v704_v53 = vadd.f32 %v703_v24, %v602_v23 }
  0xe5   : > { %v604_v25 = vpop.f32.mrf.mxu0  ;;  %v705_v26 = vpop.f32.mrf.mxu1 }
  0xe6   : > { %v706_v58 = vadd.f32 %v705_v26, %v604_v25 }
  0xe7   : > { %v608_v27 = vpop.f32.mrf.mxu0  ;;  %v709_v28 = vpop.f32.mrf.mxu1 }
  0xe8   : > { %v710_v0 = vadd.f32 %v709_v28, %v608_v27 }
  0xe9   : > { %v610_v29 = vpop.f32.mrf.mxu0  ;;  %v711_v30 = vpop.f32.mrf.mxu1 }
  0xea   : > { %v712_v6 = vadd.f32 %v711_v30, %v610_v29 }
  0xeb   : > { %v614_v31 = vpop.f32.mrf.mxu0  ;;  %v715_v32 = vpop.f32.mrf.mxu1 }
  0xec   : > { %v716_v10 = vadd.f32 %v715_v32, %v614_v31 }
  0xed   : > { %v616_v33 = vpop.f32.mrf.mxu0  ;;  %v717_v34 = vpop.f32.mrf.mxu1 }
  0xee   : > { %v718_v17 = vadd.f32 %v717_v34, %v616_v33 }
  0xef   : > { %v811_v35 = vpop.f32.mrf.mxu0  ;;  %v933_v36 = vpop.f32.mrf.mxu1 }
  0xf0   : > { %v834_v49 = vadd.f32 %v811_v35, %v698_v45 }
  0xf1   : > { %v813_v37 = vpop.f32.mrf.mxu0  ;;  %v935_v38 = vpop.f32.mrf.mxu1 }
  0xf2   : > { %v835_v54 = vadd.f32 %v813_v37, %v700_v48  ;;  %v956_v59 = vadd.f32 %v933_v36, %v834_v49 }
  0xf3   : > { %v817_v39 = vpop.f32.mrf.mxu0  ;;  %v939_v42 = vpop.f32.mrf.mxu1 }
  0xf4   : > { %v836_v60 = vadd.f32 %v817_v39, %v704_v53  ;;  %v957_v1 = vadd.f32 %v935_v38, %v835_v54  ;;  %v1114_v54 = vld [vmem:[%s4692_s3] sm:$0xff] }
  0xf5   : > { %v819_v41 = vpop.f32.mrf.mxu0  ;;  %v941_v46 = vpop.f32.mrf.mxu1  ;;  %3117 = vmatprep.mubr.msk.f32.mxu0 %vm1235_vm2, %v1114_v54  ;;  %v2902_v54 = vld [vmem:[%s4694_s5 + $0x1f8] sm:$0xff] }
  0xf6   : > { %v837_v2 = vadd.f32 %v819_v41, %v706_v58  ;;  %v958_v7 = vadd.f32 %v939_v42, %v836_v60  ;;  %v1345_v58 = vld [vmem:[%s4694_s5 + $0x90] sm:$0xff]  ;;  %v1343_v60 = vld [vmem:[%s4694_s5 + $0x80] sm:$0xff] }
  0xf7   : > { %v823_v43 = vpop.f32.mrf.mxu0  ;;  %v945_v56 = vpop.f32.mrf.mxu1 }
  0xf8   : > { %v838_v8 = vadd.f32 %v823_v43, %v710_v0  ;;  %v959_v13 = vadd.f32 %v941_v46, %v837_v2  ;;  %v1339_v0 = vld [vmem:[%s4694_s5 + $0x60] sm:$0xff]  ;;  %v1337_v2 = vld [vmem:[%s4694_s5 + $0x50] sm:$0xff] }
  0xf9   : > { %v825_v47 = vpop.f32.mrf.mxu0  ;;  %v947_v4 = vpop.f32.mrf.mxu1 }
  0xfa   : > { %v839_v14 = vadd.f32 %v825_v47, %v712_v6  ;;  %v960_v21 = vadd.f32 %v945_v56, %v838_v8  ;;  %v1347_v56 = vld [vmem:[%s4694_s5 + $0xa0] sm:$0xf] }
  0xfb   : > { %v829_v50 = vpop.f32.mrf.mxu0  ;;  %v951_v19 = vpop.f32.mrf.mxu1 }
  0xfc   : > { %v840_v22 = vadd.f32 %v829_v50, %v716_v10  ;;  %v961_v26 = vadd.f32 %v947_v4, %v839_v14  ;;  %v2872_v14 = vld [vmem:[%s4694_s5 + $0x148] sm:$0xff] }
  0xfd   : > { %v831_v57 = vpop.f32.mrf.mxu0  ;;  %v953_v30 = vpop.f32.mrf.mxu1 }
  0xfe   : > { %v841_v27 = vadd.f32 %v831_v57, %v718_v17  ;;  %v962_v32 = vadd.f32 %v951_v19, %v840_v22  ;;  %v1346_v57 = vld [vmem:[%s4694_s5 + $0x98] sm:$0xff]  ;;  %v2869_v17 = vld [vmem:[%s4694_s5 + $0x130] sm:$0xff]  ;;  %v2868_v19 = vld [vmem:[%s4694_s5 + $0x128] sm:$0xff] }
  0xff   : > { %v1055_v61 = vpop.f32.mrf.mxu0  ;;  %v2865_v22 = vld [vmem:[%s4694_s5 + $0x110] sm:$0xff] }
 0x100   : > { %v1078_v3 = vadd.f32 %v1055_v61, %v956_v59  ;;  %v963_v36 = vadd.f32 %v953_v30, %v841_v27  ;;  %v1344_v59 = vld [vmem:[%s4694_s5 + $0x88] sm:$0xff]  ;;  %v1342_v61 = vld [vmem:[%s4694_s5 + $0x78] sm:$0xff]  ;;  %v2861_v27 = vld [vmem:[%s4694_s5 + $0xf0] sm:$0xff] }
 0x101   : > { %v1057_v5 = vpop.f32.mrf.mxu0  ;;  %v1334_v30 = vld [vmem:[%s4694_s5 + $0x38] sm:$0xff] }
 0x102   : > { %v1079_v9 = vadd.f32 %v1057_v5, %v957_v1  ;;  %v1098_v11 = vadd.f32 %v1091_v62, %v1078_v3  ;;  %v1338_v1 = vld [vmem:[%s4694_s5 + $0x58] sm:$0xff] }
 0x103   : > { %v1061_v12 = vpop.f32.mrf.mxu0 }
 0x104   : > { %v1099_v15 = vadd.f32 %v1095_v63, %v1079_v9  ;;  %v1080_v16 = vadd.f32 %v1061_v12, %v958_v7  ;;  %v2874_v12 = vld [vmem:[%s4694_s5 + $0x158] sm:$0xf] }
 0x105   : > { %v1063_v20 = vpop.f32.mrf.mxu0 }
 0x106   : > { %3341 = vtanh.f32 %v1099_v15  ;;  %v1081_v23 = vadd.f32 %v1063_v20, %v959_v13  ;;  %v1100_v24 = vadd.f32 %v1091_v62, %v1080_v16  ;;  %v2873_v13 = vld [vmem:[%s4694_s5 + $0x150] sm:$0xf]  ;;  %v2871_v15 = vld [vmem:[%s4694_s5 + $0x140] sm:$0xff]  ;;  %v2870_v16 = vld [vmem:[%s4694_s5 + $0x138] sm:$0xff] }
 0x107   : > { %3343 = vtanh.f32 %v1098_v11  ;;  %v1067_v25 = vpop.f32.mrf.mxu0  ;;  %v1115_v11 = vld [vmem:[%s4692_s3 + $0x8] sm:$0x3f]  ;;  %v2867_v20 = vld [vmem:[%s4694_s5 + $0x120] sm:$0xff] }
 0x108   : > { %v1101_v28 = vadd.f32 %v1095_v63, %v1081_v23  ;;  %v1082_v29 = vadd.f32 %v1067_v25, %v960_v21  ;;  %v2866_v21 = vld [vmem:[%s4694_s5 + $0x118] sm:$0xff]  ;;  %v2864_v23 = vld [vmem:[%s4694_s5 + $0x108] sm:$0xff] }
 0x109   : > { %v1069_v31 = vpop.f32.mrf.mxu0  ;;  %v2862_v25 = vld [vmem:[%s4694_s5 + $0xf8] sm:$0xff] }
 0x10a   : > { %3345 = vtanh.f32 %v1101_v28  ;;  %v1083_v35 = vadd.f32 %v1069_v31, %v961_v26  ;;  %v1102_v33 = vadd.f32 %v1091_v62, %v1082_v29  ;;  %v1336_v26 = vld [vmem:[%s4694_s5 + $0x48] sm:$0xff]  ;;  %v1335_v28 = vld [vmem:[%s4694_s5 + $0x40] sm:$0xff] }
 0x10b   : > { %3347 = vtanh.f32 %v1100_v24  ;;  %v1073_v34 = vpop.f32.mrf.mxu0  ;;  %v2863_v24 = vld [vmem:[%s4694_s5 + $0x100] sm:$0xff]  ;;  %v2860_v29 = vld [vmem:[%s4694_s5 + $0xe8] sm:$0xff] }
 0x10c   : > { %v1103_v37 = vadd.f32 %v1095_v63, %v1083_v35  ;;  %v1084_v38 = vadd.f32 %v1073_v34, %v962_v32  ;;  %v2859_v31 = vld [vmem:[%s4694_s5 + $0xe0] sm:$0xff]  ;;  %v1333_v32 = vld [vmem:[%s4694_s5 + $0x30] sm:$0xff]  ;;  %v2858_v35 = vld [vmem:[%s4694_s5 + $0xd8] sm:$0xff] }
 0x10d   : > { %v1075_v39 = vpop.f32.mrf.mxu0  ;;  %v2857_v34 = vld [vmem:[%s4694_s5 + $0xd0] sm:$0xff] }
 0x10e   : > { %3349 = vtanh.f32 %v1103_v37  ;;  %v1085_v40 = vadd.f32 %v1075_v39, %v963_v36  ;;  %v1104_v41 = vadd.f32 %v1091_v62, %v1084_v38  ;;  %v1341_v62 = vld [vmem:[%s4694_s5 + $0x70] sm:$0xff]  ;;  %v1331_v36 = vld [vmem:[%s4694_s5 + $0x20] sm:$0xff]  ;;  %v2856_v37 = vld [vmem:[%s4694_s5 + $0xc8] sm:$0xff] }
 0x10f   : > { %3351 = vtanh.f32 %v1102_v33  ;;  %v1332_v33 = vld [vmem:[%s4694_s5 + $0x28] sm:$0xff]  ;;  %v1330_v38 = vld [vmem:[%s4694_s5 + $0x18] sm:$0xff]  ;;  %v2855_v39 = vld [vmem:[%s4694_s5 + $0xc0] sm:$0xff] }
 0x110   : > { %v1105_v42 = vadd.f32 %v1095_v63, %v1085_v40  ;;  %v1340_v63 = vld [vmem:[%s4694_s5 + $0x68] sm:$0xff]  ;;  %v1329_v40 = vld [vmem:[%s4694_s5 + $0x10] sm:$0xff] }
 0x112   : > { %3353 = vtanh.f32 %v1105_v42  ;;  %v1328_v42 = vld [vmem:[%s4694_s5 + $0x8] sm:$0xff] }
 0x113   : > { %v3342_v43 = vpop.eup %3341  ;;  %3355 = vtanh.f32 %v1104_v41  ;;  %v2854_v41 = vld [vmem:[%s4694_s5 + $0xb8] sm:$0xff] }
 0x114   : > { %v3344_v45 = vpop.eup %3343  ;;  %2846 = vmatprep.mubr.msk.f32.mxu1 %vm1137_vm1, %v3342_v43  ;;  %v2853_v43 = vld [vmem:[%s4694_s5 + $0xb0] sm:$0xff] }
 0x115   : > { %1215 = vmatmul.mubr.f32.vlgmr.msra.gmra.mxu1 %v3344_v45  ;;  %v1327_v45 = vld [vmem:[%s4694_s5] sm:$0xff] }
 0x116   : > { %2880 = vmatpush1.msk.msra.mxu1 %vm1242_vm3, %v1347_v56 }
 0x117   : > { %v3346_v46 = vpop.eup %3345  ;;  %1487 = vmatprep.subr.mxu1 %v1346_v57  ;;  %v2928_v57 = vld [vmem:[%s4694_s5 + $0x2a8] sm:$0xff] }
 0x118   : > { %v3348_v47 = vpop.eup %3347  ;;  %2847 = vmatprep.mubr.msk.f32.mxu1 %vm1137_vm1, %v3346_v46  ;;  %1488 = vmatpush1.msra.mxu1 %v1345_v58  ;;  %v2904_v46 = vld [vmem:[%s4694_s5 + $0x208] sm:$0xf]  ;;  %v2901_v58 = vld [vmem:[%s4694_s5 + $0x1f0] sm:$0xff] }
 0x119   : > { %1220 = vmatmul.mubr.f32.gmra.mxu1 %v3348_v47  ;;  %1489 = vmatprep.subr.mxu1 %v1344_v59  ;;  %v2930_v47 = vld [vmem:[%s4694_s5 + $0x2b8] sm:$0xf]  ;;  %v2927_v59 = vld [vmem:[%s4694_s5 + $0x2a0] sm:$0xff] }
 0x11a   : > { %1490 = vmatpush1.msra.mxu1 %v1343_v60  ;;  %v2900_v60 = vld [vmem:[%s4694_s5 + $0x1e8] sm:$0xff] }
 0x11b   : > { %v3350_v48 = vpop.eup %3349  ;;  %1491 = vmatprep.subr.mxu1 %v1342_v61  ;;  %v2926_v61 = vld [vmem:[%s4694_s5 + $0x298] sm:$0xff] }
 0x11c   : > { %v3352_v49 = vpop.eup %3351  ;;  %2848 = vmatprep.mubr.msk.f32.mxu1 %vm1137_vm1, %v3350_v48  ;;  %1492 = vmatpush1.msra.mxu1 %v1341_v62  ;;  %v2899_v62 = vld [vmem:[%s4694_s5 + $0x1e0] sm:$0xff] }
 0x11d   : > { %1225 = vmatmul.mubr.f32.gmra.mxu1 %v3352_v49  ;;  %1493 = vmatprep.subr.mxu1 %v1340_v63  ;;  %v2925_v63 = vld [vmem:[%s4694_s5 + $0x290] sm:$0xff] }
 0x11e   : > { %1494 = vmatpush1.msra.mxu1 %v1339_v0  ;;  %v2898_v0 = vld [vmem:[%s4694_s5 + $0x1d8] sm:$0xff] }
 0x11f   : > { %v3354_v50 = vpop.eup %3353  ;;  %1495 = vmatprep.subr.mxu1 %v1338_v1 }
 0x120   : > { %v3356_v53 = vpop.eup %3355  ;;  %2849 = vmatprep.mubr.msk.f32.mxu1 %vm1137_vm1, %v3354_v50  ;;  %1496 = vmatpush1.msra.mxu1 %v1337_v2  ;;  %v2903_v50 = vld [vmem:[%s4694_s5 + $0x200] sm:$0xf] }
 0x121   : > { %1230 = vmatmul.mubr.f32.gmra.mxu1 %v3356_v53  ;;  %1497 = vmatprep.subr.mxu1 %v1336_v26  ;;  %v2929_v53 = vld [vmem:[%s4694_s5 + $0x2b0] sm:$0xf] }
 0x122   : > { %1539 = vmatprep.mubr.f32.mxu1 %v3431_v18  ;;  %1498 = vmatpush1.msra.mxu1 %v1335_v28  ;;  %v2913_v26 = vld [vmem:[%s4694_s5 + $0x230] sm:$0xff]  ;;  %v2912_v28 = vld [vmem:[%s4694_s5 + $0x228] sm:$0xff] }
 0x123   : > { %1499 = vmatprep.subr.mxu1 %v1334_v30  ;;  %v2911_v30 = vld [vmem:[%s4694_s5 + $0x220] sm:$0xff] }
 0x124   : > { %1500 = vmatpush1.msra.mxu1 %v1333_v32  ;;  %v2910_v32 = vld [vmem:[%s4694_s5 + $0x218] sm:$0xff] }
 0x125   : > { %1501 = vmatprep.subr.mxu1 %v1332_v33  ;;  %v2909_v33 = vld [vmem:[%s4694_s5 + $0x210] sm:$0xff] }
 0x126   : > { %1502 = vmatpush1.msra.mxu1 %v1331_v36 }
 0x127   : > { %1503 = vmatprep.subr.mxu1 %v1330_v38  ;;  %v2955_v38 = vld [vmem:[%s4694_s5 + $0x360] sm:$0xf] }
 0x128   : > { %1504 = vmatpush1.msra.mxu1 %v1329_v40  ;;  %v2953_v40 = vld [vmem:[%s4694_s5 + $0x350] sm:$0xff] }
 0x129   : > { %1505 = vmatprep.subr.mxu1 %v1328_v42 }
 0x12a   : > { %1506 = vmatpush1.msra.mxu1 %v1327_v45 }
 0x12b   : > { %2931 = vmatprep.subr.msk.mxu1 %vm1242_vm3, %v2930_v47  ;;  %v2949_v47 = vld [vmem:[%s4694_s5 + $0x330] sm:$0xff] }
 0x1d5   : > { %v1216_v3 = vpop.f32.mrf.mxu1 }
 0x1d7   : > { %v1218_v4 = vpop.f32.mrf.mxu1 }
 0x1d8   : > { %v2897_v4 = vld [vmem:[%s4694_s5 + $0x1d0] sm:$0xff] }
 0x1d9   : > { %v1221_v5 = vpop.f32.mrf.mxu1 }
 0x1db   : > { %v1223_v6 = vpop.f32.mrf.mxu1 }
 0x1dc   : > { %v2896_v6 = vld [vmem:[%s4694_s5 + $0x1c8] sm:$0xff] }
 0x1dd   : > { %v1226_v7 = vpop.f32.mrf.mxu1 }
 0x1df   : > { %v1228_v8 = vpop.f32.mrf.mxu1 }
 0x1e0   : > { %v2895_v8 = vld [vmem:[%s4694_s5 + $0x1c0] sm:$0xff] }
 0x1e1   : > { %v1231_v9 = vpop.f32.mrf.mxu1 }
 0x1e2   : > { %3109 = vmatprep.subr.msk.mxu0 %vm1242_vm3, %v1231_v9 }
 0x1e3   : > { %v1233_v10 = vpop.f32.mrf.mxu1  ;;  %3110 = vmatpush3.msk.msra.mxu0 %vm1242_vm3, %v1231_v9  ;;  %v2921_v9 = vld [vmem:[%s4694_s5 + $0x270] sm:$0xff] }
 0x1e4   : > { %3111 = vmatprep.subr.mxu0 %v1226_v7  ;;  %v2894_v10 = vld [vmem:[%s4694_s5 + $0x1b8] sm:$0xff] }
 0x1e5   : > { %3112 = vmatpush3.msra.mxu0 %v1226_v7  ;;  %v2922_v7 = vld [vmem:[%s4694_s5 + $0x278] sm:$0xff] }
 0x1e6   : > { %3113 = vmatprep.subr.mxu0 %v1221_v5 }
 0x1e7   : > { %3114 = vmatpush3.msra.mxu0 %v1221_v5  ;;  %v2923_v5 = vld [vmem:[%s4694_s5 + $0x280] sm:$0xff] }
 0x1e8   : > { %3115 = vmatprep.subr.mxu0 %v1216_v3 }
 0x1e9   : > { %3116 = vmatpush3.msra.mxu0 %v1216_v3  ;;  %v2924_v3 = vld [vmem:[%s4694_s5 + $0x288] sm:$0xff] }
 0x1ea   : > { %3118 = vmatmul.mubr.msk.f32.vlgmr.msra.gmra.mxu0 %vm1235_vm2, %v1115_v11  ;;  %2875 = vmatprep.subr.msk.mxu0 %vm1242_vm3, %v2874_v12  ;;  %v2920_v11 = vld [vmem:[%s4694_s5 + $0x268] sm:$0xff]  ;;  %v2893_v12 = vld [vmem:[%s4694_s5 + $0x1b0] sm:$0xff] }
 0x1eb   : > { %2876 = vmatpush1.msk.msra.mxu0 %vm1242_vm3, %v2873_v13  ;;  %1450 = vmatprep.mubr.f32.mxu0 %v3431_v18  ;;  %v2919_v13 = vld [vmem:[%s4694_s5 + $0x260] sm:$0xff] }
 0x1ec   : > { %1398 = vmatprep.subr.mxu0 %v2872_v14  ;;  %v2892_v14 = vld [vmem:[%s4694_s5 + $0x1a8] sm:$0xff] }
 0x1ed   : > { %1399 = vmatpush1.msra.mxu0 %v2871_v15  ;;  %v2918_v15 = vld [vmem:[%s4694_s5 + $0x258] sm:$0xff] }
 0x1ee   : > { %1400 = vmatprep.subr.mxu0 %v2870_v16  ;;  %v2891_v16 = vld [vmem:[%s4694_s5 + $0x1a0] sm:$0xff] }
 0x1ef   : > { %1401 = vmatpush1.msra.mxu0 %v2869_v17  ;;  %v2917_v17 = vld [vmem:[%s4694_s5 + $0x250] sm:$0xff] }
 0x1f0   : > { %1402 = vmatprep.subr.mxu0 %v2868_v19  ;;  %v2890_v19 = vld [vmem:[%s4694_s5 + $0x198] sm:$0xff] }
 0x1f1   : > { %1403 = vmatpush1.msra.mxu0 %v2867_v20  ;;  %v2916_v20 = vld [vmem:[%s4694_s5 + $0x248] sm:$0xff] }
 0x1f2   : > { %1404 = vmatprep.subr.mxu0 %v2866_v21  ;;  %v2889_v21 = vld [vmem:[%s4694_s5 + $0x190] sm:$0xff] }
 0x1f3   : > { %1405 = vmatpush1.msra.mxu0 %v2865_v22  ;;  %v2915_v22 = vld [vmem:[%s4694_s5 + $0x240] sm:$0xff] }
 0x1f4   : > { %1406 = vmatprep.subr.mxu0 %v2864_v23  ;;  %v2888_v23 = vld [vmem:[%s4694_s5 + $0x188] sm:$0xff] }
 0x1f5   : > { %1407 = vmatpush1.msra.mxu0 %v2863_v24  ;;  %v2914_v24 = vld [vmem:[%s4694_s5 + $0x238] sm:$0xff] }
 0x1f6   : > { %1408 = vmatprep.subr.mxu0 %v2862_v25  ;;  %v2887_v25 = vld [vmem:[%s4694_s5 + $0x180] sm:$0xff] }
 0x1f7   : > { %1409 = vmatpush1.msra.mxu0 %v2861_v27  ;;  %v2886_v27 = vld [vmem:[%s4694_s5 + $0x178] sm:$0xff] }
 0x1f8   : > { %1410 = vmatprep.subr.mxu0 %v2860_v29  ;;  %v2885_v29 = vld [vmem:[%s4694_s5 + $0x170] sm:$0xff] }
 0x1f9   : > { %1411 = vmatpush1.msra.mxu0 %v2859_v31  ;;  %v2884_v31 = vld [vmem:[%s4694_s5 + $0x168] sm:$0xff] }
 0x1fa   : > { %1412 = vmatprep.subr.mxu0 %v2858_v35  ;;  %v2883_v35 = vld [vmem:[%s4694_s5 + $0x160] sm:$0xff] }
 0x1fb   : > { %1413 = vmatpush1.msra.mxu0 %v2857_v34  ;;  %v2956_v34 = vld [vmem:[%s4694_s5 + $0x368] sm:$0xf] }
 0x1fc   : > { %1414 = vmatprep.subr.mxu0 %v2856_v37 }
 0x1fd   : > { %1415 = vmatpush1.msra.mxu0 %v2855_v39  ;;  %v2954_v39 = vld [vmem:[%s4694_s5 + $0x358] sm:$0xff] }
 0x1fe   : > { %1416 = vmatprep.subr.mxu0 %v2854_v41  ;;  %v2952_v41 = vld [vmem:[%s4694_s5 + $0x348] sm:$0xff] }
 0x1ff   : > { %1417 = vmatpush1.msra.mxu0 %v2853_v43  ;;  %v2951_v43 = vld [vmem:[%s4694_s5 + $0x340] sm:$0xff] }
 0x200   : > { %2905 = vmatprep.subr.msk.mxu0 %vm1242_vm3, %v2904_v46  ;;  %v2950_v46 = vld [vmem:[%s4694_s5 + $0x338] sm:$0xff] }
 0x2aa   : > { %v3119_v48 = vpop.f32.mrf.mxu0 }
 0x2ab   : > { %1324 = vst.msk [vmem:[#allocation2 + $0x8] sm:$0x3f] %vm1323_vm4, %v3119_v48  ;;  %v2948_v48 = vld [vmem:[%s4694_s5 + $0x328] sm:$0xff] }
 0x2ac   : > { %v1312_v49 = vpop.f32.mrf.mxu0 }
 0x2ad   : > { %1322 = vst.msk [vmem:[#allocation2] sm:$0xff] %vm1321_vm5, %v1312_v49  ;;  %v2947_v49 = vld [vmem:[%s4694_s5 + $0x320] sm:$0xff] }
 0x2b2   : > { %v1350_v1 = vld [vmem:[#allocation2 + $0x9] sm:$0x3]  ;;  %v1671_v42 = vld [vmem:[#allocation2 + $0xb] sm:$0x3] }
 0x2b3   : > { %v1326_v2 = vld [vmem:[#allocation2 + $0x8] sm:$0x3]  ;;  %v1553_v45 = vld [vmem:[#allocation2 + $0xa] sm:$0x3] }
 0x2b4   : > { %v1349_v55 = vld [vmem:[#allocation2 + $0x1] sm:$0xff] }
 0x2b5   : > { %v1325_v56 = vld [vmem:[#allocation2] sm:$0xff]  ;;  %2877 = vmatmul.mubr.msk.f32.vlgmr.msra.gmra.mxu0 %vm1321_vm5, %v1349_v55 }
 0x2b6   : > { %2881 = vmatmul.mubr.msk.f32.vlgmr.msra.gmra.mxu1 %vm1321_vm5, %v1325_v56  ;;  %2906 = vmatpush1.msk.msra.mxu0 %vm1242_vm3, %v2903_v50  ;;  %v1552_v36 = vld [vmem:[#allocation2 + $0x2] sm:$0xff]  ;;  %v2946_v50 = vld [vmem:[%s4694_s5 + $0x318] sm:$0xff] }
 0x2b7   : > { %2932 = vmatpush1.msk.msra.mxu1 %vm1242_vm3, %v2929_v53  ;;  %1601 = vmatprep.subr.mxu0 %v2902_v54  ;;  %v1670_v37 = vld [vmem:[#allocation2 + $0x3] sm:$0xff]  ;;  %v2945_v53 = vld [vmem:[%s4694_s5 + $0x310] sm:$0xff]  ;;  %v2942_v56 = vld [vmem:[%s4694_s5 + $0x2f8] sm:$0xff] }
 0x2b8   : > { %1719 = vmatprep.subr.mxu1 %v2928_v57  ;;  %1602 = vmatpush1.msra.mxu0 %v2901_v58  ;;  %v2944_v54 = vld [vmem:[%s4694_s5 + $0x308] sm:$0xff]  ;;  %v2943_v55 = vld [vmem:[%s4694_s5 + $0x300] sm:$0xff]  ;;  %v2941_v57 = vld [vmem:[%s4694_s5 + $0x2f0] sm:$0xff] }
 0x2b9   : > { %1720 = vmatpush1.msra.mxu1 %v2927_v59  ;;  %1456 = vmatprep.mubr.f32.mxu0 %v3431_v18  ;;  %v2940_v58 = vld [vmem:[%s4694_s5 + $0x2e8] sm:$0xff]  ;;  %v2939_v59 = vld [vmem:[%s4694_s5 + $0x2e0] sm:$0xff] }
 0x2ba   : > { %1545 = vmatprep.mubr.f32.mxu1 %v3431_v18  ;;  %1603 = vmatprep.subr.mxu0 %v2900_v60  ;;  %v2938_v60 = vld [vmem:[%s4694_s5 + $0x2d8] sm:$0xff] }
 0x2bb   : > { %1721 = vmatprep.subr.mxu1 %v2926_v61  ;;  %2878 = vmatmul.mubr.msk.f32.gmra.mxu0 %vm1321_vm5, %v1350_v1  ;;  %v2937_v61 = vld [vmem:[%s4694_s5 + $0x2d0] sm:$0xff]  ;;  %v1789_v1 = vld [vmem:[#allocation2 + $0xc] sm:$0x3] }
 0x2bc   : > { %2882 = vmatmul.mubr.msk.f32.gmra.mxu1 %vm1321_vm5, %v1326_v2  ;;  %1604 = vmatpush1.msra.mxu0 %v2899_v62  ;;  %v2936_v62 = vld [vmem:[%s4694_s5 + $0x2c8] sm:$0xff]  ;;  %v1942_v2 = vld [vmem:[%s4697_s8 + $0x78] sm:$0xff] }
 0x2bd   : > { %1722 = vmatpush1.msra.mxu1 %v2925_v63  ;;  %1605 = vmatprep.subr.mxu0 %v2898_v0  ;;  %v2935_v63 = vld [vmem:[%s4694_s5 + $0x2c0] sm:$0xff] }
 0x2be   : > { %1723 = vmatprep.subr.mxu1 %v2924_v3  ;;  %1606 = vmatpush1.msra.mxu0 %v2897_v4  ;;  %v1788_v0 = vld [vmem:[#allocation2 + $0x4] sm:$0xff]  ;;  %v1941_v3 = vld [vmem:[%s4697_s8 + $0x70] sm:$0xff] }
 0x2bf   : > { %1724 = vmatpush1.msra.mxu1 %v2923_v5  ;;  %1607 = vmatprep.subr.mxu0 %v2896_v6  ;;  %v1940_v4 = vld [vmem:[%s4697_s8 + $0x68] sm:$0xff]  ;;  %v1939_v5 = vld [vmem:[%s4697_s8 + $0x60] sm:$0xff]  ;;  %v1938_v6 = vld [vmem:[%s4697_s8 + $0x58] sm:$0xff] }
 0x2c0   : > { %1725 = vmatprep.subr.mxu1 %v2922_v7  ;;  %1608 = vmatpush1.msra.mxu0 %v2895_v8  ;;  %v1937_v7 = vld [vmem:[%s4697_s8 + $0x50] sm:$0xff]  ;;  %v1936_v8 = vld [vmem:[%s4697_s8 + $0x48] sm:$0xff] }
 0x2c1   : > { %1726 = vmatpush1.msra.mxu1 %v2921_v9  ;;  %1609 = vmatprep.subr.mxu0 %v2894_v10  ;;  %v1935_v9 = vld [vmem:[%s4697_s8 + $0x40] sm:$0xff]  ;;  %v1934_v10 = vld [vmem:[%s4697_s8 + $0x38] sm:$0xff] }
 0x2c2   : > { %1727 = vmatprep.subr.mxu1 %v2920_v11  ;;  %1610 = vmatpush1.msra.mxu0 %v2893_v12  ;;  %v1933_v11 = vld [vmem:[%s4697_s8 + $0x30] sm:$0xff]  ;;  %v1932_v12 = vld [vmem:[%s4697_s8 + $0x28] sm:$0xff] }
 0x2c3   : > { %1728 = vmatpush1.msra.mxu1 %v2919_v13  ;;  %1611 = vmatprep.subr.mxu0 %v2892_v14  ;;  %v1931_v13 = vld [vmem:[%s4697_s8 + $0x20] sm:$0xff]  ;;  %v1930_v14 = vld [vmem:[%s4697_s8 + $0x18] sm:$0xff] }
 0x2c4   : > { %1729 = vmatprep.subr.mxu1 %v2918_v15  ;;  %1612 = vmatpush1.msra.mxu0 %v2891_v16  ;;  %v1929_v15 = vld [vmem:[%s4697_s8 + $0x10] sm:$0xff]  ;;  %v1928_v16 = vld [vmem:[%s4697_s8 + $0x8] sm:$0xff] }
 0x2c5   : > { %1730 = vmatpush1.msra.mxu1 %v2917_v17  ;;  %1613 = vmatprep.subr.mxu0 %v2890_v19  ;;  %v1927_v17 = vld [vmem:[%s4697_s8] sm:$0xff]  ;;  %v1946_v19 = vld [vmem:[%s4697_s8 + $0x98] sm:$0xff] }
 0x2c6   : > { %1731 = vmatprep.subr.mxu1 %v2916_v20  ;;  %1614 = vmatpush1.msra.mxu0 %v2889_v21  ;;  %v1945_v20 = vld [vmem:[%s4697_s8 + $0x90] sm:$0xff]  ;;  %v1944_v21 = vld [vmem:[%s4697_s8 + $0x88] sm:$0xff] }
 0x2c7   : > { %1732 = vmatpush1.msra.mxu1 %v2915_v22  ;;  %1615 = vmatprep.subr.mxu0 %v2888_v23  ;;  %v1943_v22 = vld [vmem:[%s4697_s8 + $0x80] sm:$0xff] }
 0x2c8   : > { %1733 = vmatprep.subr.mxu1 %v2914_v24  ;;  %1616 = vmatpush1.msra.mxu0 %v2887_v25 }
 0x2c9   : > { %1734 = vmatpush1.msra.mxu1 %v2913_v26  ;;  %1617 = vmatprep.subr.mxu0 %v2886_v27 }
 0x2ca   : > { %1735 = vmatprep.subr.mxu1 %v2912_v28  ;;  %1618 = vmatpush1.msra.mxu0 %v2885_v29 }
 0x2cb   : > { %1736 = vmatpush1.msra.mxu1 %v2911_v30  ;;  %1619 = vmatprep.subr.mxu0 %v2884_v31 }
 0x2cc   : > { %1737 = vmatprep.subr.mxu1 %v2910_v32  ;;  %1620 = vmatpush1.msra.mxu0 %v2883_v35 }
 0x2cd   : > { %1653 = vmatprep.mubr.f32.mxu0 %v3431_v18  ;;  %1738 = vmatpush1.msra.mxu1 %v2909_v33 }
 0x2ce   : > { %1771 = vmatprep.mubr.f32.mxu1 %v3431_v18  ;;  %2907 = vmatmul.mubr.msk.f32.vlgmr.msra.gmra.mxu0 %vm1321_vm5, %v1552_v36 }
 0x2cf   : > { %2933 = vmatmul.mubr.msk.f32.vlgmr.msra.gmra.mxu1 %vm1321_vm5, %v1670_v37  ;;  %2957 = vmatprep.subr.msk.mxu0 %vm1242_vm3, %v2956_v34 }
 0x2d0   : > { %1659 = vmatprep.mubr.f32.mxu0 %v3431_v18  ;;  %2958 = vmatpush1.msk.msra.mxu0 %vm1242_vm3, %v2955_v38 }
 0x2d1   : > { %1777 = vmatprep.mubr.f32.mxu1 %v3431_v18  ;;  %1837 = vmatprep.subr.mxu0 %v2954_v39 }
 0x2d2   : > { %1953 = vmatprep.subr.mxu1 %v3431_v18  ;;  %1838 = vmatpush1.msra.mxu0 %v2953_v40 }
 0x2d3   : > { %2934 = vmatmul.mubr.msk.f32.gmra.mxu1 %vm1321_vm5, %v1671_v42  ;;  %2908 = vmatmul.mubr.msk.f32.gmra.mxu0 %vm1321_vm5, %v1553_v45 }
 0x2d4   : > { %1839 = vmatprep.subr.mxu0 %v2952_v41  ;;  %1889 = vmatprep.mubr.f32.mxu0 %v3431_v18  ;;  %v1906_v41 = vld [vmem:[%s4695_s6] sm:$0x3] }
 0x2d5   : > { %1840 = vmatpush1.msra.mxu0 %v2951_v43  ;;  %1954 = vmatpush1.msra.mxu1 %v1942_v2 }
 0x2d6   : > { %1841 = vmatprep.subr.mxu0 %v2950_v46  ;;  %1955 = vmatprep.subr.mxu1 %v3431_v18 }
 0x2d7   : > { %1842 = vmatpush1.msra.mxu0 %v2949_v47  ;;  %1956 = vmatpush1.msra.mxu1 %v1941_v3 }
 0x2d8   : > { %1843 = vmatprep.subr.mxu0 %v2948_v48  ;;  %1957 = vmatprep.subr.mxu1 %v3431_v18 }
 0x2d9   : > { %1844 = vmatpush1.msra.mxu0 %v2947_v49  ;;  %1958 = vmatpush1.msra.mxu1 %v1940_v4  ;;  %v1911_v49 = vrot.slane %v1906_v41, %v1090_v51 }
 0x2da   : > { %1845 = vmatprep.subr.mxu0 %v2946_v50  ;;  %1959 = vmatprep.subr.mxu1 %v3431_v18 }
 0x2db   : > { %1846 = vmatpush1.msra.mxu0 %v2945_v53  ;;  %1960 = vmatpush1.msra.mxu1 %v1939_v5 }
 0x2dc   : > { %1847 = vmatprep.subr.mxu0 %v2944_v54  ;;  %1961 = vmatprep.subr.mxu1 %v3431_v18 }
 0x2dd   : > { %1848 = vmatpush1.msra.mxu0 %v2943_v55  ;;  %1962 = vmatpush1.msra.mxu1 %v1938_v6  ;;  %v1915_v55 = vrot.slane %v1906_v41, %v1094_v52  ;;  %v2986_v6 = vld [vmem:[%s4698_s9 + $0xe8] sm:$0xff]  ;;  %v3006_v41 = vld [vmem:[%s4698_s9 + $0x178] sm:$0xff] }
 0x2de   : > { %1849 = vmatprep.subr.mxu0 %v2942_v56  ;;  %1963 = vmatprep.subr.mxu1 %v3431_v18 }
 0x2df   : > { %1850 = vmatpush1.msra.mxu0 %v2941_v57  ;;  %1964 = vmatpush1.msra.mxu1 %v1937_v7  ;;  %v2985_v7 = vld [vmem:[%s4698_s9 + $0xe0] sm:$0xff] }
 0x2e0   : > { %1851 = vmatprep.subr.mxu0 %v2940_v58  ;;  %1965 = vmatprep.subr.mxu1 %v3431_v18 }
 0x2e1   : > { %1852 = vmatpush1.msra.mxu0 %v2939_v59  ;;  %1966 = vmatpush1.msra.mxu1 %v1936_v8  ;;  %v2984_v8 = vld [vmem:[%s4698_s9 + $0xd8] sm:$0xff] }
 0x2e2   : > { %1853 = vmatprep.subr.mxu0 %v2938_v60  ;;  %1967 = vmatprep.subr.mxu1 %v3431_v18 }
 0x2e3   : > { %1854 = vmatpush1.msra.mxu0 %v2937_v61  ;;  %1968 = vmatpush1.msra.mxu1 %v1935_v9  ;;  %v2983_v9 = vld [vmem:[%s4698_s9 + $0xd0] sm:$0xff] }
 0x2e4   : > { %1855 = vmatprep.subr.mxu0 %v2936_v62  ;;  %1969 = vmatprep.subr.mxu1 %v3431_v18 }
 0x2e5   : > { %1856 = vmatpush1.msra.mxu0 %v2935_v63  ;;  %1970 = vmatpush1.msra.mxu1 %v1934_v10  ;;  %v2982_v10 = vld [vmem:[%s4698_s9 + $0xc8] sm:$0xff] }
 0x2e6   : > { %2959 = vmatmul.mubr.msk.f32.vlgmr.msra.gmra.mxu0 %vm1321_vm5, %v1788_v0  ;;  %3120 = vmatprep.subr.mxu0 %v3431_v18 }
 0x2e7   : > { %1895 = vmatprep.mubr.f32.mxu0 %v3431_v18  ;;  %1971 = vmatprep.subr.mxu1 %v3431_v18 }
 0x2e8   : > { %1972 = vmatpush1.msra.mxu1 %v1933_v11  ;;  %v2981_v11 = vld [vmem:[%s4698_s9 + $0xc0] sm:$0xff] }
 0x2e9   : > { %1973 = vmatprep.subr.mxu1 %v3431_v18 }
 0x2ea   : > { %2960 = vmatmul.mubr.msk.f32.gmra.mxu0 %vm1321_vm5, %v1789_v1  ;;  %1974 = vmatpush1.msra.mxu1 %v1932_v12 }
 0x2eb   : > { %1975 = vmatprep.subr.mxu1 %v3431_v18  ;;  %3124 = vmatprep.mubr.msk.f32.mxu0 %vm3432_vm6, %v3431_v18 }
 0x2ec   : > { %1976 = vmatpush1.msra.mxu1 %v1931_v13 }
 0x2ed   : > { %1977 = vmatprep.subr.mxu1 %v3431_v18 }
 0x2ee   : > { %1978 = vmatpush1.msra.mxu1 %v1930_v14 }
 0x2ef   : > { %1979 = vmatprep.subr.mxu1 %v3431_v18 }
 0x2f0   : > { %1980 = vmatpush1.msra.mxu1 %v1929_v15  ;;  %v1926_v15 = vld [vmem:[%s4696_s7] sm:$0x1f] }
 0x2f1   : > { %1981 = vmatprep.subr.mxu1 %v3431_v18 }
 0x2f2   : > { %1982 = vmatpush1.msra.mxu1 %v1928_v16 }
 0x2f3   : > { %1983 = vmatprep.subr.mxu1 %v3431_v18 }
 0x2f4   : > { %1984 = vmatpush1.msra.mxu1 %v1927_v17  ;;  %v2974_v17 = vld [vmem:[%s4698_s9 + $0x98] sm:$0xff] }
 0x2f5   : > { %2009 = vmatprep.subr.mxu1 %v3431_v18 }
 0x2f6   : > { %2010 = vmatpush2.msra.mxu1 %v1946_v19  ;;  %v2973_v19 = vld [vmem:[%s4698_s9 + $0x90] sm:$0xff] }
 0x2f7   : > { %2011 = vmatprep.subr.mxu1 %v3431_v18 }
 0x2f8   : > { %2012 = vmatpush2.msra.mxu1 %v1945_v20  ;;  %v2972_v20 = vld [vmem:[%s4698_s9 + $0x88] sm:$0xff] }
 0x2f9   : > { %2013 = vmatprep.subr.mxu1 %v3431_v18 }
 0x2fa   : > { %2014 = vmatpush2.msra.mxu1 %v1944_v21  ;;  %v2971_v21 = vld [vmem:[%s4698_s9 + $0x80] sm:$0xff] }
 0x2fb   : > { %2015 = vmatprep.subr.mxu1 %v3431_v18 }
 0x2fc   : > { %2016 = vmatpush2.msra.mxu1 %v1943_v22  ;;  %v2970_v22 = vld [vmem:[%s4698_s9 + $0x78] sm:$0xff] }
 0x2fd   : > { %3173 = vmatprep.subr.mxu1 %v3431_v18 }
 0x375   : > { %v1452_v23 = vpop.f32.mrf.mxu0 }
 0x376   : > { %v1541_v25 = vpop.f32.mrf.mxu1 }
 0x377   : > { %v1454_v24 = vpop.f32.mrf.mxu0  ;;  %v1542_v33 = vadd.f32 %v1541_v25, %v1452_v23  ;;  %v2969_v23 = vld [vmem:[%s4698_s9 + $0x70] sm:$0xff]  ;;  %v2980_v25 = vld [vmem:[%s4698_s9 + $0xb8] sm:$0xff] }
 0x378   : > { %v1543_v27 = vpop.f32.mrf.mxu1 }
 0x379   : > { %v1544_v36 = vadd.f32 %v1543_v27, %v1454_v24  ;;  %v2968_v24 = vld [vmem:[%s4698_s9 + $0x68] sm:$0xff]  ;;  %v2979_v27 = vld [vmem:[%s4698_s9 + $0xb0] sm:$0xff] }
 0x37b   : > { %v1458_v26 = vpop.f32.mrf.mxu0 }
 0x37c   : > { %v1547_v29 = vpop.f32.mrf.mxu1 }
 0x37d   : > { %v1460_v28 = vpop.f32.mrf.mxu0  ;;  %v1548_v39 = vadd.f32 %v1547_v29, %v1458_v26  ;;  %v2967_v26 = vld [vmem:[%s4698_s9 + $0x60] sm:$0xff]  ;;  %v2978_v29 = vld [vmem:[%s4698_s9 + $0xa8] sm:$0xff] }
 0x37e   : > { %v1549_v31 = vpop.f32.mrf.mxu1 }
 0x37f   : > { %v1550_v43 = vadd.f32 %v1549_v31, %v1460_v28  ;;  %v2966_v28 = vld [vmem:[%s4698_s9 + $0x58] sm:$0xff]  ;;  %v2977_v31 = vld [vmem:[%s4698_s9 + $0xa0] sm:$0xff] }
 0x38e   : > { %v1655_v30 = vpop.f32.mrf.mxu0 }
 0x38f   : > { %v1773_v35 = vpop.f32.mrf.mxu1  ;;  %v1666_v37 = vadd.f32 %v1655_v30, %v1542_v33  ;;  %v2965_v30 = vld [vmem:[%s4698_s9 + $0x50] sm:$0xff]  ;;  %v2118_v33 = vld [vmem:[%s4698_s9 + $0x48] sm:$0xff] }
 0x390   : > { %v1657_v32 = vpop.f32.mrf.mxu0 }
 0x391   : > { %v1775_v38 = vpop.f32.mrf.mxu1  ;;  %v1667_v40 = vadd.f32 %v1657_v32, %v1544_v36  ;;  %v1784_v45 = vadd.f32 %v1773_v35, %v1666_v37 }
 0x393   : > { %v1661_v34 = vpop.f32.mrf.mxu0  ;;  %v1779_v47 = vpop.f32.mrf.mxu1  ;;  %v1785_v50 = vadd.f32 %v1775_v38, %v1667_v40  ;;  %v2117_v38 = vld [vmem:[%s4698_s9 + $0x40] sm:$0xff]  ;;  %v2116_v40 = vld [vmem:[%s4698_s9 + $0x38] sm:$0xff] }
 0x394   : > { %v1668_v46 = vadd.f32 %v1661_v34, %v1548_v39  ;;  %v3008_v34 = vld [vmem:[%s4698_s9 + $0x188] sm:$0xff]  ;;  %v3007_v39 = vld [vmem:[%s4698_s9 + $0x180] sm:$0xff] }
 0x395   : > { %v1663_v42 = vpop.f32.mrf.mxu0  ;;  %v1781_v59 = vpop.f32.mrf.mxu1 }
 0x396   : > { %v1669_v53 = vadd.f32 %v1663_v42, %v1550_v43  ;;  %v1786_v57 = vadd.f32 %v1779_v47, %v1668_v46  ;;  %v2115_v42 = vld [vmem:[%s4698_s9 + $0x30] sm:$0xff]  ;;  %v3004_v46 = vld [vmem:[%s4698_s9 + $0x168] sm:$0xff]  ;;  %v2113_v47 = vld [vmem:[%s4698_s9 + $0x20] sm:$0xff] }
 0x397   : > { %v3005_v43 = vld [vmem:[%s4698_s9 + $0x170] sm:$0xff] }
 0x398   : > { %v1787_v62 = vadd.f32 %v1781_v59, %v1669_v53  ;;  %v2111_v53 = vld [vmem:[%s4698_s9 + $0x10] sm:$0xff]  ;;  %v2997_v59 = vld [vmem:[%s4698_s9 + $0x138] sm:$0xff] }
 0x3a6   : > { %v1891_v48 = vpop.f32.mrf.mxu0 }
 0x3a7   : > { %v1902_v54 = vadd.f32 %v1891_v48, %v1784_v45  ;;  %v2114_v45 = vld [vmem:[%s4698_s9 + $0x28] sm:$0xff]  ;;  %v3003_v48 = vld [vmem:[%s4698_s9 + $0x160] sm:$0xff] }
 0x3a8   : > { %v1893_v56 = vpop.f32.mrf.mxu0 }
 0x3a9   : > { %v1903_v58 = vadd.f32 %v1893_v56, %v1785_v50  ;;  %v1918_v60 = vadd.f32 %v1911_v49, %v1902_v54  ;;  %v3002_v50 = vld [vmem:[%s4698_s9 + $0x158] sm:$0xff]  ;;  %v3001_v54 = vld [vmem:[%s4698_s9 + $0x150] sm:$0xff]  ;;  %v3000_v56 = vld [vmem:[%s4698_s9 + $0x148] sm:$0xff] }
 0x3aa   : > { %v1897_v61 = vpop.f32.mrf.mxu0 }
 0x3ab   : > { %v1919_v63 = vadd.f32 %v1915_v55, %v1903_v58  ;;  %v1904_v0 = vadd.f32 %v1897_v61, %v1786_v57  ;;  %v2109_v57 = vld [vmem:[%s4698_s9] sm:$0xff] }
 0x3ac   : > { %v1899_v1 = vpop.f32.mrf.mxu0  ;;  %v2999_v58 = vld [vmem:[%s4698_s9 + $0x140] sm:$0xff] }
 0x3ad   : > { %3357 = vtanh.f32 %v1919_v63  ;;  %v1905_v2 = vadd.f32 %v1899_v1, %v1787_v62  ;;  %v1920_v51 = vadd.f32 %v1911_v49, %v1904_v0  ;;  %v2112_v49 = vld [vmem:[%s4698_s9 + $0x18] sm:$0xff]  ;;  %v2996_v62 = vld [vmem:[%s4698_s9 + $0x130] sm:$0xff]  ;;  %v2995_v63 = vld [vmem:[%s4698_s9 + $0x128] sm:$0xff] }
 0x3ae   : > { %3359 = vtanh.f32 %v1918_v60  ;;  %v2994_v0 = vld [vmem:[%s4698_s9 + $0x120] sm:$0xff]  ;;  %v2993_v1 = vld [vmem:[%s4698_s9 + $0x118] sm:$0xff] }
 0x3af   : > { %v1921_v3 = vadd.f32 %v1915_v55, %v1905_v2  ;;  %v2110_v55 = vld [vmem:[%s4698_s9 + $0x8] sm:$0xff]  ;;  %v2992_v2 = vld [vmem:[%s4698_s9 + $0x110] sm:$0xff] }
 0x3b1   : > { %3361 = vtanh.f32 %v1921_v3  ;;  %v2990_v3 = vld [vmem:[%s4698_s9 + $0x100] sm:$0xff] }
 0x3b2   : > { %3363 = vtanh.f32 %v1920_v51  ;;  %v2991_v51 = vld [vmem:[%s4698_s9 + $0x108] sm:$0xff] }
 0x3ba   : > { %v3358_v4 = vpop.eup %3357 }
 0x3bb   : > { %v3360_v44 = vpop.eup %3359  ;;  %2961 = vmatprep.mubr.msk.f32.mxu1 %vm517_vm0, %v3358_v4  ;;  %v2989_v4 = vld [vmem:[%s4698_s9 + $0xf8] sm:$0xff] }
 0x3bc   : > { %2018 = vmatmul.mubr.f32.vlgmr.msra.gmra.mxu1 %v3360_v44  ;;  %v2988_v44 = vld [vmem:[%s4698_s9 + $0xf0] sm:$0xff] }
 0x3bd   : > { %3174 = vmatpush3.msra.mxu1 %v2986_v6  ;;  %v2552_v6 = vld [vmem:[%s4700_s11 + $0x68] sm:$0xff] }
 0x3be   : > { %v3362_v52 = vpop.eup %3361  ;;  %3175 = vmatprep.subr.mxu1 %v3431_v18 }
 0x3bf   : > { %v3364_v5 = vpop.eup %3363  ;;  %2962 = vmatprep.mubr.msk.f32.mxu1 %vm517_vm0, %v3362_v52  ;;  %3176 = vmatpush3.msra.mxu1 %v2985_v7  ;;  %v2551_v7 = vld [vmem:[%s4700_s11 + $0x60] sm:$0xff] }
 0x3c0   : > { %2023 = vmatmul.mubr.f32.gmra.mxu1 %v3364_v5  ;;  %3177 = vmatprep.subr.mxu1 %v3431_v18  ;;  %v2553_v5 = vld [vmem:[%s4700_s11 + $0x70] sm:$0xff] }
 0x3c1   : > { %3193 = vmatprep.mubr.msk.f32.mxu1 %vm3432_vm6, %v3431_v18  ;;  %3178 = vmatpush3.msra.mxu1 %v2984_v8  ;;  %v2550_v8 = vld [vmem:[%s4700_s11 + $0x58] sm:$0xff] }
 0x3c2   : > { %3179 = vmatprep.subr.mxu1 %v3431_v18 }
 0x3c3   : > { %3180 = vmatpush3.msra.mxu1 %v2983_v9  ;;  %v2549_v9 = vld [vmem:[%s4700_s11 + $0x50] sm:$0xff] }
 0x3c4   : > { %3181 = vmatprep.subr.mxu1 %v3431_v18 }
 0x3c5   : > { %3182 = vmatpush3.msra.mxu1 %v2982_v10  ;;  %v2548_v10 = vld [vmem:[%s4700_s11 + $0x48] sm:$0xff] }
 0x3c6   : > { %3183 = vmatprep.subr.mxu1 %v3431_v18 }
 0x3c7   : > { %3184 = vmatpush3.msra.mxu1 %v2981_v11  ;;  %v2547_v11 = vld [vmem:[%s4700_s11 + $0x40] sm:$0xff] }
 0x3c8   : > { %3185 = vmatprep.subr.mxu1 %v3431_v18 }
 0x3c9   : > { %3186 = vmatpush3.msra.mxu1 %v2980_v25 }
 0x3ca   : > { %3187 = vmatprep.subr.mxu1 %v3431_v18 }
 0x3cb   : > { %3188 = vmatpush3.msra.mxu1 %v2979_v27 }
 0x3cc   : > { %3189 = vmatprep.subr.mxu1 %v3431_v18 }
 0x3cd   : > { %3190 = vmatpush3.msra.mxu1 %v2978_v29 }
 0x3ce   : > { %3191 = vmatprep.subr.mxu1 %v3431_v18 }
 0x3cf   : > { %3192 = vmatpush3.msra.mxu1 %v2977_v31 }
 0x3d0   : > { %3219 = vmatprep.subr.mxu1 %v3431_v18 }
 0x47c   : > { %v2019_v12 = vpop.f32.mrf.mxu1 }
 0x47e   : > { %v2021_v13 = vpop.f32.mrf.mxu1 }
 0x47f   : > { %v2545_v13 = vld [vmem:[%s4700_s11 + $0x30] sm:$0xff] }
 0x480   : > { %v2024_v14 = vpop.f32.mrf.mxu1 }
 0x481   : > { %3121 = vmatpush3.msk.msra.mxu0 %vm2032_vm7, %v2024_v14  ;;  %v2544_v14 = vld [vmem:[%s4700_s11 + $0x28] sm:$0xff] }
 0x482   : > { %v2026_v16 = vpop.f32.mrf.mxu1  ;;  %3122 = vmatprep.subr.mxu0 %v3431_v18 }
 0x483   : > { %3123 = vmatpush3.msra.mxu0 %v2019_v12  ;;  %v2546_v12 = vld [vmem:[%s4700_s11 + $0x38] sm:$0xff] }
 0x484   : > { %3125 = vmatmul.mubr.msk.f32.vlgmr.msra.gmra.mxu0 %vm2028_vm8, %v1926_v15  ;;  %3127 = vmatprep.subr.mxu0 %v3431_v18  ;;  %v2543_v15 = vld [vmem:[%s4700_s11 + $0x20] sm:$0xff]  ;;  %v2542_v16 = vld [vmem:[%s4700_s11 + $0x18] sm:$0xff] }
 0x485   : > { %3128 = vmatpush3.msra.mxu0 %v2974_v17  ;;  %3147 = vmatprep.mubr.msk.f32.mxu0 %vm3432_vm6, %v3431_v18  ;;  %v2541_v17 = vld [vmem:[%s4700_s11 + $0x10] sm:$0xff] }
 0x486   : > { %3129 = vmatprep.subr.mxu0 %v3431_v18 }
 0x487   : > { %3130 = vmatpush3.msra.mxu0 %v2973_v19  ;;  %v2540_v19 = vld [vmem:[%s4700_s11 + $0x8] sm:$0xff] }
 0x488   : > { %3131 = vmatprep.subr.mxu0 %v3431_v18 }
 0x489   : > { %3132 = vmatpush3.msra.mxu0 %v2972_v20  ;;  %v2539_v20 = vld [vmem:[%s4700_s11] sm:$0xff] }
 0x48a   : > { %3133 = vmatprep.subr.mxu0 %v3431_v18 }
 0x48b   : > { %3134 = vmatpush3.msra.mxu0 %v2971_v21  ;;  %v2640_v21 = vld [vmem:[%s4702_s13 + $0x50] sm:$0xf] }
 0x48c   : > { %3135 = vmatprep.subr.mxu0 %v3431_v18 }
 0x48d   : > { %3136 = vmatpush3.msra.mxu0 %v2970_v22  ;;  %v2639_v22 = vld [vmem:[%s4702_s13 + $0x48] sm:$0xff] }
 0x48e   : > { %3137 = vmatprep.subr.mxu0 %v3431_v18 }
 0x48f   : > { %3138 = vmatpush3.msra.mxu0 %v2969_v23 }
 0x490   : > { %3139 = vmatprep.subr.mxu0 %v3431_v18 }
 0x491   : > { %3140 = vmatpush3.msra.mxu0 %v2968_v24 }
 0x492   : > { %3141 = vmatprep.subr.mxu0 %v3431_v18 }
 0x493   : > { %3142 = vmatpush3.msra.mxu0 %v2967_v26 }
 0x494   : > { %3143 = vmatprep.subr.mxu0 %v3431_v18 }
 0x495   : > { %3144 = vmatpush3.msra.mxu0 %v2966_v28 }
 0x496   : > { %3145 = vmatprep.subr.mxu0 %v3431_v18 }
 0x497   : > { %3146 = vmatpush3.msra.mxu0 %v2965_v30 }
 0x498   : > { %3150 = vmatprep.subr.mxu0 %v3431_v18 }
 0x544   : > { %v2102_v32 = vpop.f32.mrf.mxu0 }
 0x545   : > { %2107 = vst.msk [vmem:[#allocation3] sm:$0x1f] %vm2106_vm9, %v2102_v32 }
 0x546   : > { %v3126_v35 = vpop.f32.mrf.mxu0 }
 0x54c   : > { %v2119_v36 = vld [vmem:[#allocation3 + $0x1] sm:$0x1]  ;;  %v2278_v37 = vld [vmem:[#allocation3 + $0x2] sm:$0x1]  ;;  %v2108_v60 = vld [vmem:[#allocation3] sm:$0x1] }
 0x54d   : > { %3148 = vmatmul.mubr.msk.f32.vlgmr.msra.gmra.mxu0 %vm2131_vm10, %v2119_v36  ;;  %3194 = vmatmul.mubr.msk.f32.vlgmr.msra.gmra.mxu1 %vm2131_vm10, %v2278_v37  ;;  %v2450_v61 = vld [vmem:[#allocation3 + $0x4] sm:$0x1]  ;;  %v2364_v52 = vld [vmem:[#allocation3 + $0x3] sm:$0x1] }
 0x54e   : > { %3151 = vmatpush3.msra.mxu0 %v2118_v33  ;;  %3220 = vmatpush3.msra.mxu1 %v3008_v34  ;;  %v2536_v34 = vld [vmem:[%s4699_s10] sm:$0x1] }
 0x54f   : > { %3152 = vmatprep.subr.mxu0 %v3431_v18  ;;  %3221 = vmatprep.subr.mxu1 %v3431_v18 }
 0x550   : > { %3153 = vmatpush3.msra.mxu0 %v2117_v38  ;;  %3222 = vmatpush3.msra.mxu1 %v3007_v39 }
 0x551   : > { %3154 = vmatprep.subr.mxu0 %v3431_v18  ;;  %3223 = vmatprep.subr.mxu1 %v3431_v18 }
 0x552   : > { %3155 = vmatpush3.msra.mxu0 %v2116_v40  ;;  %3224 = vmatpush3.msra.mxu1 %v3006_v41  ;;  %v2638_v40 = vld [vmem:[%s4702_s13 + $0x40] sm:$0xff]  ;;  %v2637_v41 = vld [vmem:[%s4702_s13 + $0x38] sm:$0xff] }
 0x553   : > { %3156 = vmatprep.subr.mxu0 %v3431_v18  ;;  %3225 = vmatprep.subr.mxu1 %v3431_v18 }
 0x554   : > { %3157 = vmatpush3.msra.mxu0 %v2115_v42  ;;  %3226 = vmatpush3.msra.mxu1 %v3005_v43  ;;  %v2636_v42 = vld [vmem:[%s4702_s13 + $0x30] sm:$0xff]  ;;  %v2635_v43 = vld [vmem:[%s4702_s13 + $0x28] sm:$0xff] }
 0x555   : > { %3158 = vmatprep.subr.mxu0 %v3431_v18  ;;  %3227 = vmatprep.subr.mxu1 %v3431_v18 }
 0x556   : > { %3159 = vmatpush3.msra.mxu0 %v2114_v45  ;;  %3228 = vmatpush3.msra.mxu1 %v3004_v46  ;;  %v2634_v45 = vld [vmem:[%s4702_s13 + $0x20] sm:$0xff]  ;;  %v2633_v46 = vld [vmem:[%s4702_s13 + $0x18] sm:$0xff] }
 0x557   : > { %3160 = vmatprep.subr.mxu0 %v3431_v18  ;;  %3229 = vmatprep.subr.mxu1 %v3431_v18 }
 0x558   : > { %3161 = vmatpush3.msra.mxu0 %v2113_v47  ;;  %3230 = vmatpush3.msra.mxu1 %v3003_v48  ;;  %v2632_v47 = vld [vmem:[%s4702_s13 + $0x10] sm:$0xff]  ;;  %v2631_v48 = vld [vmem:[%s4702_s13 + $0x8] sm:$0xff] }
 0x559   : > { %3162 = vmatprep.subr.mxu0 %v3431_v18  ;;  %3231 = vmatprep.subr.mxu1 %v3431_v18 }
 0x55a   : > { %3163 = vmatpush3.msra.mxu0 %v2112_v49  ;;  %3232 = vmatpush3.msra.mxu1 %v3002_v50  ;;  %v2630_v49 = vld [vmem:[%s4702_s13] sm:$0xff] }
 0x55b   : > { %3164 = vmatprep.subr.mxu0 %v3431_v18  ;;  %3233 = vmatprep.subr.mxu1 %v3431_v18  ;;  %v2554_v50 = vld [vmem:[%s4701_s12] sm:$0x1] }
 0x55c   : > { %3165 = vmatpush3.msra.mxu0 %v2111_v53  ;;  %3234 = vmatpush3.msra.mxu1 %v3001_v54 }
 0x55d   : > { %3166 = vmatprep.subr.mxu0 %v3431_v18  ;;  %3235 = vmatprep.subr.mxu1 %v3431_v18 }
 0x55e   : > { %3167 = vmatpush3.msra.mxu0 %v2110_v55  ;;  %3236 = vmatpush3.msra.mxu1 %v3000_v56 }
 0x55f   : > { %3168 = vmatprep.subr.mxu0 %v3431_v18  ;;  %3237 = vmatprep.subr.mxu1 %v3431_v18 }
 0x560   : > { %3169 = vmatpush3.msra.mxu0 %v2109_v57  ;;  %3170 = vmatprep.mubr.msk.f32.mxu0 %vm3432_vm6, %v3431_v18  ;;  %v2641_v57 = vld [vmem:[%s4703_s14] sm:$0x1] }
 0x561   : > { %3238 = vmatpush3.msra.mxu1 %v2999_v58  ;;  %3239 = vmatprep.mubr.msk.f32.mxu1 %vm3432_vm6, %v3431_v18 }
 0x562   : > { %3171 = vmatmul.mubr.msk.f32.vlgmr.msra.gmra.mxu0 %vm2131_vm10, %v2108_v60  ;;  %3196 = vmatprep.subr.mxu0 %v3431_v18 }
 0x563   : > { %3240 = vmatmul.mubr.msk.f32.vlgmr.msra.gmra.mxu1 %vm2131_vm10, %v2450_v61  ;;  %3197 = vmatpush3.msra.mxu0 %v2997_v59 }
 0x564   : > { %3198 = vmatprep.subr.mxu0 %v3431_v18  ;;  %3216 = vmatprep.mubr.msk.f32.mxu0 %vm3432_vm6, %v3431_v18 }
 0x565   : > { %3199 = vmatpush3.msra.mxu0 %v2996_v62  ;;  %3275 = vmatprep.subr.mxu1 %v3431_v18 }
 0x566   : > { %3200 = vmatprep.subr.mxu0 %v3431_v18  ;;  %3297 = vmatprep.mubr.msk.f32.mxu1 %vm3432_vm6, %v3431_v18 }
 0x567   : > { %3201 = vmatpush3.msra.mxu0 %v2995_v63  ;;  %3276 = vmatpush3.msk.msra.mxu1 %vm1242_vm3, %v2640_v21 }
 0x568   : > { %3202 = vmatprep.subr.mxu0 %v3431_v18  ;;  %3277 = vmatprep.subr.mxu1 %v3431_v18 }
 0x569   : > { %3203 = vmatpush3.msra.mxu0 %v2994_v0  ;;  %3278 = vmatpush3.msra.mxu1 %v2639_v22 }
 0x56a   : > { %3204 = vmatprep.subr.mxu0 %v3431_v18  ;;  %3279 = vmatprep.subr.mxu1 %v3431_v18 }
 0x56b   : > { %3205 = vmatpush3.msra.mxu0 %v2993_v1  ;;  %3280 = vmatpush3.msra.mxu1 %v2638_v40 }
 0x56c   : > { %3206 = vmatprep.subr.mxu0 %v3431_v18  ;;  %3281 = vmatprep.subr.mxu1 %v3431_v18 }
 0x56d   : > { %3207 = vmatpush3.msra.mxu0 %v2992_v2  ;;  %3282 = vmatpush3.msra.mxu1 %v2637_v41 }
 0x56e   : > { %3208 = vmatprep.subr.mxu0 %v3431_v18  ;;  %3283 = vmatprep.subr.mxu1 %v3431_v18 }
 0x56f   : > { %3209 = vmatpush3.msra.mxu0 %v2991_v51  ;;  %3284 = vmatpush3.msra.mxu1 %v2636_v42 }
 0x570   : > { %3210 = vmatprep.subr.mxu0 %v3431_v18  ;;  %3285 = vmatprep.subr.mxu1 %v3431_v18 }
 0x571   : > { %3211 = vmatpush3.msra.mxu0 %v2990_v3  ;;  %3286 = vmatpush3.msra.mxu1 %v2635_v43 }
 0x572   : > { %3212 = vmatprep.subr.mxu0 %v3431_v18  ;;  %3287 = vmatprep.subr.mxu1 %v3431_v18 }
 0x573   : > { %3213 = vmatpush3.msra.mxu0 %v2989_v4  ;;  %3288 = vmatpush3.msra.mxu1 %v2634_v45 }
 0x574   : > { %3214 = vmatprep.subr.mxu0 %v3431_v18  ;;  %3289 = vmatprep.subr.mxu1 %v3431_v18 }
 0x575   : > { %3215 = vmatpush3.msra.mxu0 %v2988_v44  ;;  %3290 = vmatpush3.msra.mxu1 %v2633_v46 }
 0x576   : > { %3217 = vmatmul.mubr.msk.f32.vlgmr.msra.gmra.mxu0 %vm2131_vm10, %v2364_v52  ;;  %3242 = vmatprep.subr.mxu0 %v3431_v18 }
 0x577   : > { %3272 = vmatprep.mubr.msk.f32.mxu0 %vm3432_vm6, %v3431_v18  ;;  %3243 = vmatpush3.msra.mxu0 %v2553_v5 }
 0x578   : > { %3244 = vmatprep.subr.mxu0 %v3431_v18  ;;  %3291 = vmatprep.subr.mxu1 %v3431_v18 }
 0x579   : > { %3245 = vmatpush3.msra.mxu0 %v2552_v6  ;;  %3292 = vmatpush3.msra.mxu1 %v2632_v47 }
 0x57a   : > { %3246 = vmatprep.subr.mxu0 %v3431_v18  ;;  %3293 = vmatprep.subr.mxu1 %v3431_v18 }
 0x57b   : > { %3247 = vmatpush3.msra.mxu0 %v2551_v7  ;;  %3294 = vmatpush3.msra.mxu1 %v2631_v48 }
 0x57c   : > { %3248 = vmatprep.subr.mxu0 %v3431_v18  ;;  %3295 = vmatprep.subr.mxu1 %v3431_v18 }
 0x57d   : > { %3249 = vmatpush3.msra.mxu0 %v2550_v8  ;;  %3296 = vmatpush3.msra.mxu1 %v2630_v49 }
 0x57e   : > { %3250 = vmatprep.subr.mxu0 %v3431_v18 }
 0x57f   : > { %3251 = vmatpush3.msra.mxu0 %v2549_v9 }
 0x580   : > { %3252 = vmatprep.subr.mxu0 %v3431_v18 }
 0x581   : > { %3253 = vmatpush3.msra.mxu0 %v2548_v10 }
 0x582   : > { %3254 = vmatprep.subr.mxu0 %v3431_v18 }
 0x583   : > { %3255 = vmatpush3.msra.mxu0 %v2547_v11 }
 0x584   : > { %3256 = vmatprep.subr.mxu0 %v3431_v18 }
 0x585   : > { %3257 = vmatpush3.msra.mxu0 %v2546_v12 }
 0x586   : > { %3258 = vmatprep.subr.mxu0 %v3431_v18 }
 0x587   : > { %3259 = vmatpush3.msra.mxu0 %v2545_v13 }
 0x588   : > { %3260 = vmatprep.subr.mxu0 %v3431_v18 }
 0x589   : > { %3261 = vmatpush3.msra.mxu0 %v2544_v14 }
 0x58a   : > { %3262 = vmatprep.subr.mxu0 %v3431_v18 }
 0x58b   : > { %3263 = vmatpush3.msra.mxu0 %v2543_v15 }
 0x58c   : > { %3264 = vmatprep.subr.mxu0 %v3431_v18 }
 0x58d   : > { %3265 = vmatpush3.msra.mxu0 %v2542_v16 }
 0x58e   : > { %3266 = vmatprep.subr.mxu0 %v3431_v18 }
 0x58f   : > { %3267 = vmatpush3.msra.mxu0 %v2541_v17 }
 0x590   : > { %3268 = vmatprep.subr.mxu0 %v3431_v18 }
 0x591   : > { %3269 = vmatpush3.msra.mxu0 %v2540_v19 }
 0x592   : > { %3270 = vmatprep.subr.mxu0 %v3431_v18 }
 0x593   : > { %3271 = vmatpush3.msra.mxu0 %v2539_v20 }
 0x60d   : > { %v2201_v23 = vpop.f32.mrf.mxu0  ;;  %v2359_v24 = vpop.f32.mrf.mxu1 }
 0x60f   : > { %v3149_v25 = vpop.f32.mrf.mxu0  ;;  %v3195_v26 = vpop.f32.mrf.mxu1 }
 0x622   : > { %v2274_v27 = vpop.f32.mrf.mxu0 }
 0x623   : > { %v2531_v28 = vpop.f32.mrf.mxu1  ;;  %v2275_v31 = vadd.f32 %v2274_v27, %v2201_v23 }
 0x624   : > { %v3172_v29 = vpop.f32.mrf.mxu0 }
 0x625   : > { %v3241_v30 = vpop.f32.mrf.mxu1  ;;  %v2363_v32 = vadd.f32 %v2359_v24, %v2275_v31 }
 0x636   : > { %v2445_v35 = vpop.f32.mrf.mxu0 }
 0x637   : > { %v2449_v33 = vadd.f32 %v2445_v35, %v2363_v32 }
 0x638   : > { %v3218_v36 = vpop.f32.mrf.mxu0 }
 0x639   : > { %v2535_v37 = vadd.f32 %v2531_v28, %v2449_v33 }
 0x63b   : > { %v2537_v38 = vadd.f32 %v2536_v34, %v2535_v37 }
 0x63d   : > { %3365 = vtanh.f32 %v2537_v38 }
 0x64a   : > { %v3366_v39 = vpop.eup %3365 }
 0x64b   : > { %3273 = vmatmul.mubr.msk.f32.vlgmr.msra.gmra.mxu0 %vm2555_vm11, %v3366_v39 }
 0x70b   : > { %v2625_v53 = vpop.f32.mrf.mxu0 }
 0x70c   : > { %v2626_v54 = vadd.f32 %v2625_v53, %v2554_v50 }
 0x70d   : > { %v3274_v55 = vpop.f32.mrf.mxu0 }
 0x70e   : > { %3367 = vtanh.f32 %v2626_v54 }
 0x71b   : > { %v3368_v56 = vpop.eup %3367 }
 0x71c   : > { %3298 = vmatmul.mubr.msk.f32.vlgmr.msra.gmra.mxu1 %vm1321_vm5, %v3368_v56 }
 0x7dc   : > { %v2714_v18 = vpop.f32.mrf.mxu1 }
 0x7dd   : > { %v2715_v58 = vadd.f32 %v2714_v18, %v2641_v57 }
 0x7de   : > { %v3299_v59 = vpop.f32.mrf.mxu1 }
 0x7df   : > { %2719 = vst.msk [vmem:[%s486_s17] sm:$0x1] %vm2718_vm12, %v2715_v58 }
 0x7e0   : > { %3382 = shalt.err (!%p3379_p3)
}
 0x7e1   : > { %s3383_s16 = scalar_lea.hbm %s4654_s20, 16  ;;  %s3387_s26 = scalar_lea.hbm %s4704_s15, 32 }
 0x7e2   : > { %p3384_p4 = scmp.ne.s32.totalorder %s4654_s20, %s3383_s16  ;;  %p3388_p9 = scmp.lt.s32.totalorder %s4654_s20, %s4704_s15 }
 0x7e3   : > { %p3389_p10 = scmp.lt.s32.totalorder %s3387_s26, %s3383_s16 }
 0x7e4   : > { %p3385_p7 = pnand %p3384_p4, %p3552_p5 }
 0x7e5   : > { %p3390_p11 = por %p3389_p10, %p3388_p9 }
 0x7e6   : > { %p3386_p8 = pneg %p3385_p7 }
 0x7e8   : > { %p3391_p12 = pnand %p3390_p11, %p3386_p8 }
 0x7ea   : > { %3394 = shalt.err (!%p3391_p12)
}
 0x7eb   : > { %3300 = dma.vmem_to_hbm [thread:$0]  (%p3552_p5), %s2734_s25, 16, %s4654_s20, %s2721_s27  }
 0x7ec PF: > { %s4717_s30 = sld [smem:[#allocation7_spill]]  ;;  %p3306_p13 = scmp.ge.s32.totalorder %s3429_s21, 2 }
 0x7ee   : > { %p3303_p0 = pnand %p3306_p13, %p3556_p6 }
 0x7f0   : > { %p3304_p1 = pneg %p3303_p0 }
 0x7f2   : > { %s2745_s18 = sand.u32 1, %s4717_s30  }
 0x7f3   : > { %s2746_s23 = scalar_lea.sflag [#allocation5], %s2745_s18 }
 0x7f4   : > { %3412 = dma.done.wait (%p3304_p1), %s2746_s23, 16  }
 0x7f5   : > { %3414 = vsyncadd (%p3304_p1), %s2746_s23, 4294967280  ;;  %s4719_s21 = sld [smem:[#allocation9_spill]]  ;;  %s4722_s18 = smov %s3421_s19 }
 0x7f6   : > { %s4720_s16 = sld [smem:[#allocation8_spill]] }
 0x7f7   : > { %s4721_s20 = sld [smem:[#allocation10_spill]] }
 0x7fb   : > { %p25_p2 = scmp.ge.s32.totalorder %s4719_s21, 4  }
 0x7fc   : > { %s4723_s19 = smov %s4720_s16 }
 0x7fd   :  { %27 = sbr.rel (!%p25_p2) target bundleno = 3 (0x3), region = 127 }
 0x802   :  { %2750 = vsyncpa [#allocation5], 1 }
 0x803   :  { %2752 = vsyncpa [#allocation5 + $0x1], 1 }

</bundles_post_ra>
